<compile_context>
chip_gen: v6e
topology: v6e:2x2x1
jax: 0.10.0
libtpu: 0.0.40
codegen_flags: <defaults>
</compile_context>

<pallas_src>
import functools

import numpy as np

import jax
import jax.numpy as jnp
from jax.experimental import pallas as pl
from jax.experimental.pallas import tpu as pltpu

EMBED_SIZE = 128
KERNEL_SIZES = (2, 3, 4, 5, 6)
NUM_FILTERS = 150
NUM_CLASSES = 6          # stand-in for len(label_encoder.classes_)
VOCAB_SIZE = 50          # stand-in for len(vocab) + 1
BN_EPS = 1e-5

NUM_BRANCHES = len(KERNEL_SIZES)
K_MAX = max(KERNEL_SIZES)
V_PAD = 128                              # vocab padded to one 128-lane tile
F_TOT = NUM_BRANCHES * NUM_FILTERS       # 750 packed filter columns
F_TOT_PAD = 768                          # 750 -> 6 x 128 lanes
KE = K_MAX * EMBED_SIZE                  # 768: K dim of the packed conv matmul
C_PAD = 128                              # NUM_CLASSES padded to one lane tile
PAD_ROWS = 16                            # zero tail rows of the time-shift buffer

assert PAD_ROWS >= K_MAX - 1, "time-shift buffer padding must cover K_MAX-1 rows"
assert F_TOT_PAD >= F_TOT and F_TOT_PAD % 128 == 0


# ----------------------------- fused Pallas kernel ---------------------------

def _fused_cnn_kernel(tok_ref, table_ref, convw_ref, scale_ref, shift_ref,
                      mask_ref, fcw_ref, fcb_ref, out_ref, emb_buf, *, tb, seq_len):
    """Whole CNNModel forward (eval semantics) for one batch tile.

    tok_ref:   (TB*L, 1)  int32  token ids of this batch tile (flattened)
    table_ref: (V_PAD, E) bf16   zero-padded embedding table
    convw_ref: (KE, F_TOT_PAD) bf16  packed conv weight (all branches, all shifts)
    scale_ref: (1, F_TOT_PAD) f32    folded BN scale  = gamma / sqrt(var + eps)
    shift_ref: (1, F_TOT_PAD) f32    folded BN shift  = beta - mean*scale + bias*scale
    mask_ref:  (TB*L, F_TOT_PAD) f32 0/1 valid-time mask (per packed filter column)
    fcw_ref:   (F_TOT_PAD, C_PAD) bf16   packed FC weight
    fcb_ref:   (1, C_PAD) f32            FC bias
    out_ref:   (TB, C_PAD) f32           logits for this batch tile
    emb_buf:   (TB*L + PAD_ROWS, E) f32  zero-tail-padded time-shift scratch
    """
    BL = tb * seq_len

    # ---- embedding gather as a bf16 one-hot matmul (MXU, no XLA gather) ----
    tok = tok_ref[...]                                                  # (BL, 1) i32
    vid = jax.lax.broadcasted_iota(jnp.int32, (BL, V_PAD), 1)           # (BL, V_PAD)
    onehot = (tok == vid).astype(jnp.bfloat16)                          # (BL, V_PAD)
    emb = jnp.dot(onehot, table_ref[...],
                  preferred_element_type=jnp.float32)                   # (BL, E) f32

    # zero-padded buffer so time-shifted slices never read garbage / stale VMEM
    emb_buf[BL:BL + PAD_ROWS, :] = jnp.zeros((PAD_ROWS, EMBED_SIZE), jnp.float32)
    emb_buf[0:BL, :] = emb

    # ---- all conv branches as ONE matmul:  X (BL, 768) @ W (768, 768) ----
    # X columns [i*E:(i+1)*E] hold the input shifted by i time steps; per-branch
    # weight blocks with shift >= k are zero, so every branch comes out correct.
    x = jnp.concatenate([emb_buf[i:i + BL, :] for i in range(K_MAX)], axis=1)
    y = jnp.dot(x.astype(jnp.bfloat16), convw_ref[...],
                preferred_element_type=jnp.float32)                     # (BL, F_TOT_PAD)

    # eval-mode BatchNorm2d (conv bias folded into shift) + ReLU + time mask.
    # Masking to 0 is valid because it follows ReLU (all values >= 0).
    y = jnp.maximum(y * scale_ref[...] + shift_ref[...], 0.0) * mask_ref[...]

    # max over time per batch element
    pooled = jnp.max(y.reshape(tb, seq_len, F_TOT_PAD), axis=1)         # (TB, F_TOT_PAD)

    # single FC over the packed (concatenated) pooled features
    out_ref[...] = (jnp.dot(pooled.astype(jnp.bfloat16), fcw_ref[...],
                            preferred_element_type=jnp.float32) + fcb_ref[...])


# ------------------------------ wrapper ---------------------------------------

def cnn_model_forward(tokens, params, *, batch_tile=8):
    """Forward pass matching CNNModel.forward (inference semantics)."""
    B, L = tokens.shape
    assert L >= K_MAX, f"sequence length {L} must be >= max kernel size {K_MAX}"

    TB = min(batch_tile, B)
    n_tiles = -(-B // TB)
    B_pad = n_tiles * TB
    assert (TB * L) % 8 == 0 or n_tiles == 1
    bl = TB * L

    tokens = tokens.astype(jnp.int32)
    if B_pad != B:
        tokens = jnp.concatenate(
            [tokens, jnp.zeros((B_pad - B, L), jnp.int32)], axis=0)
    tok_flat = tokens.reshape(B_pad * L, 1)

    # 0/1 valid-time mask per packed filter column, tiled over the batch tile.
    # Column c belongs to branch br = c // 150 with kernel size k; time steps
    # t > L - k are invalid (cross-batch / zero-pad contamination).
    k_of_col = np.full((F_TOT_PAD,), K_MAX, np.int32)
    for br, k in enumerate(KERNEL_SIZES):
        k_of_col[br * NUM_FILTERS:(br + 1) * NUM_FILTERS] = k
    mask_np = (np.arange(L)[:, None] <= (L - k_of_col)[None, :]).astype(np.float32)
    mask = jnp.asarray(np.tile(mask_np, (TB, 1)))                       # (TB*L, F_TOT_PAD)

    kern = functools.partial(_fused_cnn_kernel, tb=TB, seq_len=L)

    flops = n_tiles * (2 * bl * V_PAD * EMBED_SIZE          # one-hot gather
                       + 2 * bl * KE * F_TOT_PAD            # packed conv
                       + 2 * TB * F_TOT_PAD * C_PAD)        # fc
    bytes_accessed = (B_pad * L * 4 + V_PAD * EMBED_SIZE * 2 + KE * F_TOT_PAD * 2
                      + 2 * F_TOT_PAD * 4 + bl * F_TOT_PAD * 4
                      + F_TOT_PAD * C_PAD * 2 + C_PAD * 4 + B_pad * C_PAD * 4)

    logits_pad = pl.pallas_call(
        kern,
        out_shape=jax.ShapeDtypeStruct((B_pad, C_PAD), jnp.float32),
        grid_spec=pltpu.PrefetchScalarGridSpec(
            num_scalar_prefetch=0,
            grid=(n_tiles,),
            in_specs=[
                pl.BlockSpec((bl, 1), lambda i: (i, 0)),                 # tokens
                pl.BlockSpec((V_PAD, EMBED_SIZE), lambda i: (0, 0)),     # table
                pl.BlockSpec((KE, F_TOT_PAD), lambda i: (0, 0)),         # packed conv W
                pl.BlockSpec((1, F_TOT_PAD), lambda i: (0, 0)),          # BN scale
                pl.BlockSpec((1, F_TOT_PAD), lambda i: (0, 0)),          # BN shift
                pl.BlockSpec((bl, F_TOT_PAD), lambda i: (0, 0)),         # time mask
                pl.BlockSpec((F_TOT_PAD, C_PAD), lambda i: (0, 0)),      # fc W
                pl.BlockSpec((1, C_PAD), lambda i: (0, 0)),              # fc b
            ],
            out_specs=pl.BlockSpec((TB, C_PAD), lambda i: (i, 0)),
            scratch_shapes=[pltpu.VMEM((bl + PAD_ROWS, EMBED_SIZE), jnp.float32)],
        ),
        compiler_params=pltpu.CompilerParams(
            dimension_semantics=("parallel",),
            vmem_limit_bytes=32 * 1024 * 1024),
        cost_estimate=pl.CostEstimate(flops=flops, transcendentals=0,
                                      bytes_accessed=bytes_accessed),
    )(tok_flat, params["embedding"], params["conv_w"], params["scale"],
      params["shift"], mask, params["fc_w"], params["fc_b"])

    # TODO(synk): Dropout(0.6) and BatchNorm batch-statistics are training-mode only;
    #             eval-mode (identity dropout, running-stats BN) semantics are used here.
    return logits_pad[:B, :NUM_CLASSES]                                  # (B, C)


# --------------------------- parameter init -----------------------------------

def init_params(key):
    keys = jax.random.split(key, 1 + 2 * NUM_BRANCHES + 2)
    it = iter(keys)

    emb_t = jax.random.normal(next(it), (VOCAB_SIZE, EMBED_SIZE), jnp.float32)
    table = jnp.zeros((V_PAD, EMBED_SIZE), jnp.float32).at[:VOCAB_SIZE].set(emb_t)

    # packed conv weight: row (i*E + e), column (br*150 + f); zero for i >= k_br
    conv_w = jnp.zeros((KE, F_TOT_PAD), jnp.float32)
    scale = jnp.zeros((F_TOT_PAD,), jnp.float32)
    shift = jnp.zeros((F_TOT_PAD,), jnp.float32)
    for br, k in enumerate(KERNEL_SIZES):
        # torch Conv2d weight layout (F, 1, k, E); bias (F,)
        w_t = 0.05 * jax.random.normal(next(it), (NUM_FILTERS, 1, k, EMBED_SIZE), jnp.float32)
        b_t = 0.05 * jax.random.normal(next(it), (NUM_FILTERS,), jnp.float32)
        gamma = jnp.ones((NUM_FILTERS,), jnp.float32)
        beta = jnp.full((NUM_FILTERS,), 0.01, jnp.float32)
        running_mean = jnp.zeros((NUM_FILTERS,), jnp.float32)
        running_var = jnp.ones((NUM_FILTERS,), jnp.float32)

        # fold eval-mode BN and the conv bias:  y_conv_nobias * scale + shift
        s = gamma / jnp.sqrt(running_var + BN_EPS)                       # (F,)
        sh = beta - running_mean * s + b_t * s                           # (F,)

        w = jnp.transpose(w_t[:, 0, :, :], (1, 2, 0))                    # (k, E, F)
        w = w.reshape(k * EMBED_SIZE, NUM_FILTERS)                       # (k*E, F)
        col = br * NUM_FILTERS
        conv_w = conv_w.at[:k * EMBED_SIZE, col:col + NUM_FILTERS].set(w)
        scale = scale.at[col:col + NUM_FILTERS].set(s)
        shift = shift.at[col:col + NUM_FILTERS].set(sh)

    # FC over the concatenated (packed) pooled features; zero-padded to 768/128
    fc_w_t = 0.05 * jax.random.normal(next(it), (F_TOT, NUM_CLASSES), jnp.float32)
    fc_b_t = 0.05 * jax.random.normal(next(it), (NUM_CLASSES,), jnp.float32)
    fc_w = jnp.zeros((F_TOT_PAD, C_PAD), jnp.float32).at[:F_TOT, :NUM_CLASSES].set(fc_w_t)
    fc_b = jnp.zeros((1, C_PAD), jnp.float32).at[0, :NUM_CLASSES].set(fc_b_t)

    return {
        "embedding": table.astype(jnp.bfloat16),      # (V_PAD, E) bf16
        "conv_w": conv_w.astype(jnp.bfloat16),        # (KE, F_TOT_PAD) bf16
        "scale": scale[None, :],                      # (1, F_TOT_PAD) f32
        "shift": shift[None, :],                      # (1, F_TOT_PAD) f32
        "fc_w": fc_w.astype(jnp.bfloat16),            # (F_TOT_PAD, C_PAD) bf16
        "fc_b": fc_b,                                 # (1, C_PAD) f32
    }


# --------------------------------- main ----------------------------------------

if __name__ == "__main__":
    key = jax.random.PRNGKey(0)
    key_tok, key_params = jax.random.split(key)

    B, L = 2, 16                                      # batch=2, seq=16 (>= max kernel size 6)
    tokens = jax.random.randint(key_tok, (B, L), 0, VOCAB_SIZE, dtype=jnp.int32)
    params = init_params(key_params)

    logits = cnn_model_forward(tokens, params)
    jax.block_until_ready(logits)

    assert logits.shape == (B, NUM_CLASSES), logits.shape
    assert logits.dtype == jnp.float32
    print("KERNEL_OK")
</pallas_src>

<mosaic_0001>
module attributes {stable_mosaic.version = 11 : i64} {
  func.func @_fused_cnn_kernel(%arg0: i32, %arg1: memref<32x1xi32, #tpu.memory_space<vmem>>, %arg2: memref<128x128xbf16, #tpu.memory_space<vmem>>, %arg3: memref<768x768xbf16, #tpu.memory_space<vmem>>, %arg4: memref<1x768xf32, #tpu.memory_space<vmem>>, %arg5: memref<1x768xf32, #tpu.memory_space<vmem>>, %arg6: memref<32x768xf32, #tpu.memory_space<vmem>>, %arg7: memref<768x128xbf16, #tpu.memory_space<vmem>>, %arg8: memref<1x128xf32, #tpu.memory_space<vmem>>, %arg9: memref<2x128xf32, #tpu.memory_space<vmem>>, %arg10: memref<48x128xf32, #tpu.memory_space<vmem>>) attributes {dimension_semantics = [#tpu.dimension_semantics<parallel>], iteration_bounds = array<i64: 1>, scalar_prefetch = 0 : i64, scratch_operands = 1 : i64, tpu.core_type = #tpu.core_type<tc>, window_params = [{transform_indices = @transform_0, window_bounds = array<i64: 32, 1>}, {pipeline_mode = #tpu.pipeline_mode<synchronous>, transform_indices = @transform_1, window_bounds = array<i64: 128, 128>}, {pipeline_mode = #tpu.pipeline_mode<synchronous>, transform_indices = @transform_2, window_bounds = array<i64: 768, 768>}, {pipeline_mode = #tpu.pipeline_mode<synchronous>, transform_indices = @transform_3, window_bounds = array<i64: 1, 768>}, {pipeline_mode = #tpu.pipeline_mode<synchronous>, transform_indices = @transform_4, window_bounds = array<i64: 1, 768>}, {pipeline_mode = #tpu.pipeline_mode<synchronous>, transform_indices = @transform_5, window_bounds = array<i64: 32, 768>}, {pipeline_mode = #tpu.pipeline_mode<synchronous>, transform_indices = @transform_6, window_bounds = array<i64: 768, 128>}, {pipeline_mode = #tpu.pipeline_mode<synchronous>, transform_indices = @transform_7, window_bounds = array<i64: 1, 128>}, {transform_indices = @transform_8, window_bounds = array<i64: 2, 128>}]} {
    %c0 = arith.constant 0 : index
    %c0_0 = arith.constant 0 : index
    %0 = vector.load %arg1[%c0, %c0_0] : memref<32x1xi32, #tpu.memory_space<vmem>>, vector<32x1xi32>
    %1 = tpu.iota {dimensions = array<i32: 1>} : vector<32x128xi32>
    %2 = vector.broadcast %0 : vector<32x1xi32> to vector<32x128xi32>
    %3 = arith.cmpi eq, %2, %1 : vector<32x128xi32>
    %4 = arith.extui %3 : vector<32x128xi1> to vector<32x128xi32>
    %5 = arith.sitofp %4 : vector<32x128xi32> to vector<32x128xf32>
    %6 = arith.truncf %5 : vector<32x128xf32> to vector<32x128xbf16>
    %c0_1 = arith.constant 0 : index
    %c0_2 = arith.constant 0 : index
    %7 = vector.load %arg2[%c0_1, %c0_2] : memref<128x128xbf16, #tpu.memory_space<vmem>>, vector<128x128xbf16>
    %cst = arith.constant dense<0.000000e+00> : vector<32x128xf32>
    %8 = tpu.matmul %6, %7, %cst {dimension_numbers = #tpu.dot_dimension_numbers<[1], [0], [0], [1], [0, 0, 1, 1], [], []>} : vector<32x128xbf16>, vector<128x128xbf16>, vector<32x128xf32> -> vector<32x128xf32>
    %cst_3 = arith.constant 0.000000e+00 : f32
    %9 = vector.broadcast %cst_3 : f32 to vector<16x128xf32>
    %c32 = arith.constant 32 : index
    %c0_4 = arith.constant 0 : index
    %10 = vector.load %arg10[%c32, %c0_4] : memref<48x128xf32, #tpu.memory_space<vmem>>, vector<16x128xf32>
    tpu.vector_store %arg10[%c32, %c0_4], %9 {strides = array<i32>} : memref<48x128xf32, #tpu.memory_space<vmem>>, vector<16x128xf32>,
    %c0_5 = arith.constant 0 : index
    %c0_6 = arith.constant 0 : index
    %11 = vector.load %arg10[%c0_5, %c0_6] : memref<48x128xf32, #tpu.memory_space<vmem>>, vector<32x128xf32>
    tpu.vector_store %arg10[%c0_5, %c0_6], %8 {strides = array<i32>} : memref<48x128xf32, #tpu.memory_space<vmem>>, vector<32x128xf32>,
    %c0_7 = arith.constant 0 : index
    %c0_8 = arith.constant 0 : index
    %12 = vector.load %arg10[%c0_7, %c0_8] : memref<48x128xf32, #tpu.memory_space<vmem>>, vector<32x128xf32>
    %c1 = arith.constant 1 : index
    %c0_9 = arith.constant 0 : index
    %13 = vector.load %arg10[%c1, %c0_9] : memref<48x128xf32, #tpu.memory_space<vmem>>, vector<32x128xf32>
    %c2 = arith.constant 2 : index
    %c0_10 = arith.constant 0 : index
    %14 = vector.load %arg10[%c2, %c0_10] : memref<48x128xf32, #tpu.memory_space<vmem>>, vector<32x128xf32>
    %c3 = arith.constant 3 : index
    %c0_11 = arith.constant 0 : index
    %15 = vector.load %arg10[%c3, %c0_11] : memref<48x128xf32, #tpu.memory_space<vmem>>, vector<32x128xf32>
    %c4 = arith.constant 4 : index
    %c0_12 = arith.constant 0 : index
    %16 = vector.load %arg10[%c4, %c0_12] : memref<48x128xf32, #tpu.memory_space<vmem>>, vector<32x128xf32>
    %c5 = arith.constant 5 : index
    %c0_13 = arith.constant 0 : index
    %17 = vector.load %arg10[%c5, %c0_13] : memref<48x128xf32, #tpu.memory_space<vmem>>, vector<32x128xf32>
    %18 = tpu.concatenate %12, %13, %14, %15, %16, %17 in 1 : vector<32x128xf32>, vector<32x128xf32>, vector<32x128xf32>, vector<32x128xf32>, vector<32x128xf32>, vector<32x128xf32> -> vector<32x768xf32>
    %19 = arith.truncf %18 : vector<32x768xf32> to vector<32x768xbf16>
    %c0_14 = arith.constant 0 : index
    %c0_15 = arith.constant 0 : index
    %20 = vector.load %arg3[%c0_14, %c0_15] : memref<768x768xbf16, #tpu.memory_space<vmem>>, vector<768x768xbf16>
    %cst_16 = arith.constant dense<0.000000e+00> : vector<32x768xf32>
    %21 = tpu.matmul %19, %20, %cst_16 {dimension_numbers = #tpu.dot_dimension_numbers<[1], [0], [0], [1], [0, 0, 1, 1], [], []>} : vector<32x768xbf16>, vector<768x768xbf16>, vector<32x768xf32> -> vector<32x768xf32>
    %c0_17 = arith.constant 0 : index
    %c0_18 = arith.constant 0 : index
    %22 = vector.load %arg4[%c0_17, %c0_18] : memref<1x768xf32, #tpu.memory_space<vmem>>, vector<1x768xf32>
    %23 = vector.broadcast %22 : vector<1x768xf32> to vector<32x768xf32>
    %24 = arith.mulf %21, %23 : vector<32x768xf32>
    %c0_19 = arith.constant 0 : index
    %c0_20 = arith.constant 0 : index
    %25 = vector.load %arg5[%c0_19, %c0_20] : memref<1x768xf32, #tpu.memory_space<vmem>>, vector<1x768xf32>
    %26 = vector.broadcast %25 : vector<1x768xf32> to vector<32x768xf32>
    %27 = arith.addf %24, %26 : vector<32x768xf32>
    %cst_21 = arith.constant 0.000000e+00 : f32
    %28 = vector.broadcast %cst_21 : f32 to vector<32x768xf32>
    %29 = arith.maximumf %27, %28 : vector<32x768xf32>
    %c0_22 = arith.constant 0 : index
    %c0_23 = arith.constant 0 : index
    %30 = vector.load %arg6[%c0_22, %c0_23] : memref<32x768xf32, #tpu.memory_space<vmem>>, vector<32x768xf32>
    %31 = arith.mulf %29, %30 : vector<32x768xf32>
    %32 = vector.shape_cast %31 : vector<32x768xf32> to vector<2x16x768xf32>
    %cst_24 = arith.constant dense<0xFF800000> : vector<2x768xf32>
    %33 = vector.multi_reduction <maximumf>, %32, %cst_24 [1] : vector<2x16x768xf32> to vector<2x768xf32>
    %34 = arith.truncf %33 : vector<2x768xf32> to vector<2x768xbf16>
    %c0_25 = arith.constant 0 : index
    %c0_26 = arith.constant 0 : index
    %35 = vector.load %arg7[%c0_25, %c0_26] : memref<768x128xbf16, #tpu.memory_space<vmem>>, vector<768x128xbf16>
    %cst_27 = arith.constant dense<0.000000e+00> : vector<2x128xf32>
    %36 = tpu.matmul %34, %35, %cst_27 {dimension_numbers = #tpu.dot_dimension_numbers<[1], [0], [0], [1], [0, 0, 1, 1], [], []>} : vector<2x768xbf16>, vector<768x128xbf16>, vector<2x128xf32> -> vector<2x128xf32>
    %c0_28 = arith.constant 0 : index
    %c0_29 = arith.constant 0 : index
    %37 = vector.load %arg8[%c0_28, %c0_29] : memref<1x128xf32, #tpu.memory_space<vmem>>, vector<1x128xf32>
    %38 = vector.broadcast %37 : vector<1x128xf32> to vector<2x128xf32>
    %39 = arith.addf %36, %38 : vector<2x128xf32>
    %c0_30 = arith.constant 0 : index
    %c0_31 = arith.constant 0 : index
    %40 = vector.load %arg9[%c0_30, %c0_31] : memref<2x128xf32, #tpu.memory_space<vmem>>, vector<2x128xf32>
    tpu.vector_store %arg9[%c0_30, %c0_31], %39 {strides = array<i32>} : memref<2x128xf32, #tpu.memory_space<vmem>>, vector<2x128xf32>,
    return
  }
  func.func @transform_0(%arg0: i32) -> (i32, i32) {
    %c0_i32 = arith.constant 0 : i32
    %c0_i32_0 = arith.constant 0 : i32
    return %arg0, %c0_i32 : i32, i32
  }
  func.func @transform_1(%arg0: i32) -> (i32, i32) {
    %c0_i32 = arith.constant 0 : i32
    %c0_i32_0 = arith.constant 0 : i32
    %c0_i32_1 = arith.constant 0 : i32
    return %c0_i32, %c0_i32_0 : i32, i32
  }
  func.func @transform_2(%arg0: i32) -> (i32, i32) {
    %c0_i32 = arith.constant 0 : i32
    %c0_i32_0 = arith.constant 0 : i32
    %c0_i32_1 = arith.constant 0 : i32
    return %c0_i32, %c0_i32_0 : i32, i32
  }
  func.func @transform_3(%arg0: i32) -> (i32, i32) {
    %c0_i32 = arith.constant 0 : i32
    %c0_i32_0 = arith.constant 0 : i32
    %c0_i32_1 = arith.constant 0 : i32
    return %c0_i32, %c0_i32_0 : i32, i32
  }
  func.func @transform_4(%arg0: i32) -> (i32, i32) {
    %c0_i32 = arith.constant 0 : i32
    %c0_i32_0 = arith.constant 0 : i32
    %c0_i32_1 = arith.constant 0 : i32
    return %c0_i32, %c0_i32_0 : i32, i32
  }
  func.func @transform_5(%arg0: i32) -> (i32, i32) {
    %c0_i32 = arith.constant 0 : i32
    %c0_i32_0 = arith.constant 0 : i32
    %c0_i32_1 = arith.constant 0 : i32
    return %c0_i32, %c0_i32_0 : i32, i32
  }
  func.func @transform_6(%arg0: i32) -> (i32, i32) {
    %c0_i32 = arith.constant 0 : i32
    %c0_i32_0 = arith.constant 0 : i32
    %c0_i32_1 = arith.constant 0 : i32
    return %c0_i32, %c0_i32_0 : i32, i32
  }
  func.func @transform_7(%arg0: i32) -> (i32, i32) {
    %c0_i32 = arith.constant 0 : i32
    %c0_i32_0 = arith.constant 0 : i32
    %c0_i32_1 = arith.constant 0 : i32
    return %c0_i32, %c0_i32_0 : i32, i32
  }
  func.func @transform_8(%arg0: i32) -> (i32, i32) {
    %c0_i32 = arith.constant 0 : i32
    %c0_i32_0 = arith.constant 0 : i32
    return %arg0, %c0_i32 : i32, i32
  }
}

</mosaic_0001>

<bundles_post_ra>
// kernel: tpu_custom_call.1
= control target key start
LH: loop header
LB: loop body
LE: loop exit
PB: predicated region body
PF: predicated region fallthrough
CT: control target
= control target key end

     0   :  { %13 = vsyncpa [#allocation4], 0  ;;  %s4708_s0 = inlined_call_operand.vmem [shape: s32[32,1], index: 0, kind: input, shape index: {}]   ;;  %s4709_s1 = inlined_call_operand.hbm [shape: bf16[128,128], index: 1, kind: input, shape index: {}]   ;;  %s4710_s2 = inlined_call_operand.hbm [shape: bf16[768,768], index: 2, kind: input, shape index: {}]   ;;  %s4711_s3 = inlined_call_operand.hbm [shape: f32[1,768], index: 3, kind: input, shape index: {}]   ;;  %s4712_s4 = inlined_call_operand.hbm [shape: f32[1,768], index: 4, kind: input, shape index: {}]   ;;  %s4713_s5 = inlined_call_operand.hbm [shape: f32[32,768], index: 5, kind: input, shape index: {}]   ;;  %s4714_s6 = inlined_call_operand.hbm [shape: bf16[768,128], index: 6, kind: input, shape index: {}]   ;;  %s4715_s7 = inlined_call_operand.hbm [shape: f32[1,128], index: 7, kind: input, shape index: {}]   ;;  %s4716_s8 = inlined_call_operand.hbm [shape: f32[2,128], index: 8, kind: output, shape index: {}]  }
   0x1   :  { %14 = vsyncpa [#allocation7], 0 }
   0x2   :  { %15 = vsyncpa [#allocation10], 0 }
   0x3   :  { %16 = vsyncpa [#allocation13], 0 }
   0x4   :  { %17 = vsyncpa [#allocation5], 0  ;;  %s4491_s27 = smov [#allocation6]  }
   0x5   :  { %s37_s28 = sshll.u32 %s4491_s27, 4  ;;  %s38_s28 = int_to_ptr.vmem [resolvable:$true] %s37_s28 }
   0x6   :  { %s4329_s29 = scalar_lea.vmem %s38_s28, 36864  ;;  %p4334_p1 = scmp.lt.s32.totalorder %s38_s28, %s38_s28 }
   0x7   :  { %p4330_p0 = scmp.ne.s32.totalorder %s38_s28, %s4329_s29  ;;  %p4335_p2 = scmp.lt.s32.totalorder %s4329_s29, %s4329_s29 }
   0x9   :  { %p4336_p3 = por %p4335_p2, %p4334_p1 }
   0xb   :  { %p4337_p4 = pnand %p4336_p3, %p4330_p0 }
   0xd   :  { %4340 = shalt.err (!%p4337_p4)
}
   0xe   :  { %s4492_s30 = smov 384   ;;  %s4493_s9 = smov 24  }
   0xf   :  { %43 = dma.hbm_to_vmem [thread:$0]  %s4710_s2, 36864, %s38_s28, [#allocation7], %s4492_s30, %s4492_s30, %s4493_s9  }
  0x10   :  { %s4494_s12 = smov [#allocation9]  }
  0x11   :  { %s60_s13 = sshll.u32 %s4494_s12, 4  ;;  %s61_s13 = int_to_ptr.vmem [resolvable:$true] %s60_s13 }
  0x12   :  { %s4349_s14 = scalar_lea.vmem %s61_s13, 96  ;;  %p4354_p6 = scmp.lt.s32.totalorder %s61_s13, %s61_s13 }
  0x13   :  { %p4350_p5 = scmp.ne.s32.totalorder %s61_s13, %s4349_s14  ;;  %p4355_p7 = scmp.lt.s32.totalorder %s4349_s14, %s4349_s14 }
  0x15   :  { %p4356_p8 = por %p4355_p7, %p4354_p6 }
  0x17   :  { %p4357_p9 = pnand %p4356_p8, %p4350_p5 }
  0x19   :  { %4360 = shalt.err (!%p4357_p9)
}
  0x1a   :  { %63 = dma.hbm_to_vmem [thread:$0]  %s4712_s4, 96, %s61_s13, [#allocation10]  }
  0x1b   :  { %s4495_s17 = smov [#allocation12]   ;;  %s4496_s19 = smov [#allocation3]  }
  0x1c   :  { %s81_s18 = sshll.u32 %s4495_s17, 4  ;;  %s25_s20 = sshll.u32 %s4496_s19, 4  ;;  %s82_s18 = int_to_ptr.vmem [resolvable:$true] %s81_s18  ;;  %s26_s20 = int_to_ptr.vmem [resolvable:$true] %s25_s20 }
  0x1d   :  { %s4369_s2 = scalar_lea.vmem %s82_s18, 6144  ;;  %p4374_p11 = scmp.lt.s32.totalorder %s82_s18, %s82_s18 }
  0x1e   :  { %p4370_p10 = scmp.ne.s32.totalorder %s82_s18, %s4369_s2  ;;  %p4375_p12 = scmp.lt.s32.totalorder %s4369_s2, %s4369_s2 }
  0x20   :  { %p4376_p13 = por %p4375_p12, %p4374_p11 }
  0x22   :  { %p4377_p0 = pnand %p4376_p13, %p4370_p10 }
  0x24   :  { %4380 = shalt.err (!%p4377_p0)
}
  0x25   :  { %s4497_s21 = smov 64   ;;  %s4498_s22 = smov 4  }
  0x26   :  { %87 = dma.hbm_to_vmem [thread:$0]  %s4714_s6, 6144, %s82_s18, [#allocation13], %s4497_s21, %s4497_s21, %s4498_s22  }
  0x27   :  { %s4389_s4 = scalar_lea.vmem %s26_s20, 1024  ;;  %p4394_p2 = scmp.lt.s32.totalorder %s26_s20, %s26_s20 }
  0x28   :  { %p4390_p1 = scmp.ne.s32.totalorder %s26_s20, %s4389_s4  ;;  %p4395_p3 = scmp.lt.s32.totalorder %s4389_s4, %s4389_s4 }
  0x2a   :  { %p4396_p4 = por %p4395_p3, %p4394_p2 }
  0x2c   :  { %p4397_p5 = pnand %p4396_p4, %p4390_p1 }
  0x2e   :  { %4400 = shalt.err (!%p4397_p5)
}
  0x2f   :  { %31 = dma.hbm_to_vmem [thread:$0]  %s4709_s1, 1024, %s26_s20, [#allocation4], %s4497_s21, %s4497_s21, %s4498_s22  }
  0x30   :  { %s4499_s27 = smov [#allocation8]   ;;  %s4500_s29 = smov [#allocation11]  }
  0x31   :  { %s50_s28 = sshll.u32 %s4499_s27, 4  ;;  %s69_s30 = sshll.u32 %s4500_s29, 4  ;;  %s51_s28 = int_to_ptr.vmem [resolvable:$true] %s50_s28  ;;  %s70_s30 = int_to_ptr.vmem [resolvable:$true] %s69_s30 }
  0x32   :  { %s4409_s9 = scalar_lea.vmem %s51_s28, 96  ;;  %p4414_p7 = scmp.lt.s32.totalorder %s51_s28, %s51_s28 }
  0x33   :  { %p4410_p6 = scmp.ne.s32.totalorder %s51_s28, %s4409_s9  ;;  %p4415_p8 = scmp.lt.s32.totalorder %s4409_s9, %s4409_s9 }
  0x35   :  { %p4416_p9 = por %p4415_p8, %p4414_p7 }
  0x37   :  { %p4417_p10 = pnand %p4416_p9, %p4410_p6 }
  0x39   :  { %4420 = shalt.err (!%p4417_p10)
}
  0x3a   :  { %53 = dma.hbm_to_vmem [thread:$0]  %s4711_s3, 96, %s51_s28, [#allocation7]  }
  0x3b   :  { %s4429_s11 = scalar_lea.vmem %s70_s30, 3072  ;;  %p4434_p12 = scmp.lt.s32.totalorder %s70_s30, %s70_s30 }
  0x3c   :  { %p4430_p11 = scmp.ne.s32.totalorder %s70_s30, %s4429_s11  ;;  %p4435_p13 = scmp.lt.s32.totalorder %s4429_s11, %s4429_s11 }
  0x3e   :  { %p4436_p0 = por %p4435_p13, %p4434_p12 }
  0x40   :  { %p4437_p1 = pnand %p4436_p0, %p4430_p11 }
  0x42   :  { %4440 = shalt.err (!%p4437_p1)
}
  0x43   :  { %s4501_s1 = smov 768   ;;  %s4502_s12 = smov 48  }
  0x44   :  { %75 = dma.hbm_to_vmem [thread:$0]  %s4713_s5, 3072, %s70_s30, [#allocation10], %s4501_s1, %s4501_s1, %s4502_s12  }
  0x45   :  { %s4503_s15 = smov [#allocation14]  }
  0x46   :  { %s94_s16 = sshll.u32 %s4503_s15, 4  ;;  %s95_s16 = int_to_ptr.vmem [resolvable:$true] %s94_s16 }
  0x47   :  { %s4449_s17 = scalar_lea.vmem %s95_s16, 16  ;;  %s4453_s18 = scalar_lea.vmem %s95_s16, 32 }
  0x48   :  { %p4450_p2 = scmp.ne.s32.totalorder %s95_s16, %s4449_s17  ;;  %p4454_p3 = scmp.lt.s32.totalorder %s95_s16, %s95_s16 }
  0x49   :  { %p4455_p4 = scmp.lt.s32.totalorder %s4453_s18, %s4449_s17 }
  0x4b   :  { %p4456_p5 = por %p4455_p4, %p4454_p3 }
  0x4d   :  { %p4457_p6 = pnand %p4456_p5, %p4450_p2 }
  0x4f   :  { %4460 = shalt.err (!%p4457_p6)
}
  0x50   :  { %97 = dma.hbm_to_vmem [thread:$0]  %s4715_s7, 16, %s95_s16, [#allocation13]  }
  0x51   :  { %4481 = dma.done.wait [#allocation4], 1024  }
  0x52   :  { %4482 = vsyncadd [#allocation4], 4294966272 }
  0x53   :  { %4483 = dma.done.wait [#allocation7], 36960  }
  0x54   :  { %4484 = vsyncadd [#allocation7], 4294930336 }
  0x55   :  { %4485 = dma.done.wait [#allocation10], 3168  }
  0x56   :  { %4486 = vsyncadd [#allocation10], 4294964128 }
  0x57   :  { %4487 = dma.done.wait [#allocation13], 6160  }
  0x58   :  { %4488 = vsyncadd [#allocation13], 4294961136  ;;  %v4504_v0 = vmov 0   ;;  %v122_v1 = vld [vmem:[%s4708_s0 + $0x10] sm:$0xff]  ;;  %v120_v2 = vld [vmem:[%s4708_s0] sm:$0xff]  ;;  %v124_v38 = vlaneseq  ;;  %vm2919_vm6 = vcmask 1041409  }
  0x59   :  { %3832 = vset.pattern.permute.xlu1 %v4504_v0  ;;  %3831 = vset.pattern.permute.xlu0 %v4504_v0  ;;  %v123_v3 = vld [vmem:[%s4708_s0 + $0x18] sm:$0xff]  ;;  %v121_v4 = vld [vmem:[%s4708_s0 + $0x8] sm:$0xff]  ;;  %v3834_v6 = vld [vmem:[#allocation3 + $0x30] sm:$0xff]   ;;  %v4505_v46 = vmov 1.0|1.0   ;;  %s4507_s0 = smov [#allocation15]  }
  0x5a   :  { %133 = vperm.xlu1 %3832, %v122_v1   ;;  %127 = vperm.xlu0 %3831, %v120_v2   ;;  %v3833_v5 = vld [vmem:[#allocation3 + $0x38] sm:$0xff]   ;;  %v3835_v7 = vld [vmem:[#allocation3 + $0x28] sm:$0xff]   ;;  %v3836_v9 = vld [vmem:[#allocation3 + $0x20] sm:$0xff]   ;;  %v125_v39 = vand.u32 127, %v124_v38  ;;  %s3353_s4 = sshll.u32 %s4507_s0, 4  ;;  %s3354_s4 = int_to_ptr.vmem [resolvable:$true] %s3353_s4 }
  0x5b   :  { %3794 = vmatprep.subr.bf16.mxu0 %v3833_v5  ;;  %v3841_v8 = vld [vmem:[#allocation6 + $0x154] ss:$24 sps:$4 sm:$0xff]   ;;  %v3846_v10 = vld [vmem:[#allocation6 + $0x150] ss:$24 sps:$4 sm:$0xff]   ;;  %v3847_v11 = vld [vmem:[#allocation6 + $0x124] ss:$24 sps:$4 sm:$0xff]   ;;  %p4466_p8 = scmp.lt.s32.totalorder %s3354_s4, %s3354_s4 }
  0x5c   :  { %3795 = vmatpush3.bf16.msra.mxu0 %v3833_v5  ;;  %2035 = vmatprep.subr.bf16.mxu1 %v3841_v8  ;;  %v3837_v12 = vld [vmem:[#allocation3 + $0x18] sm:$0xff]   ;;  %v3853_v14 = vld [vmem:[#allocation6 + $0xf4] ss:$24 sps:$4 sm:$0xff]   ;;  %v3858_v15 = vld [vmem:[#allocation6 + $0xf0] ss:$24 sps:$4 sm:$0xff]   ;;  %s4461_s25 = scalar_lea.vmem %s3354_s4, 32 }
  0x5d   :  { %3796 = vmatprep.subr.bf16.mxu0 %v3834_v6  ;;  %2036 = vmatpush1.bf16.msra.mxu1 %v3846_v10  ;;  %v3852_v13 = vld [vmem:[#allocation6 + $0x120] ss:$24 sps:$4 sm:$0xff]   ;;  %v3859_v16 = vld [vmem:[#allocation6 + $0xc4] ss:$24 sps:$4 sm:$0xff]   ;;  %v3838_v17 = vld [vmem:[#allocation3 + $0x10] sm:$0xff]   ;;  %p4462_p7 = scmp.ne.s32.totalorder %s3354_s4, %s4461_s25  ;;  %p4467_p9 = scmp.lt.s32.totalorder %s4461_s25, %s4461_s25 }
  0x5e   :  { %136 = vperm.xlu1 %3832, %v123_v3   ;;  %130 = vperm.xlu0 %3831, %v121_v4   ;;  %v3864_v18 = vld [vmem:[#allocation6 + $0xc0] ss:$24 sps:$4 sm:$0xff]   ;;  %v3865_v19 = vld [vmem:[#allocation6 + $0x94] ss:$24 sps:$4 sm:$0xff]   ;;  %v3870_v21 = vld [vmem:[#allocation6 + $0x90] ss:$24 sps:$4 sm:$0xff]  }
  0x5f   :  { %2037 = vmatprep.subr.bf16.mxu1 %v3847_v11  ;;  %v3839_v20 = vld [vmem:[#allocation3 + $0x8] sm:$0xff]   ;;  %v3871_v22 = vld [vmem:[#allocation6 + $0x64] ss:$24 sps:$4 sm:$0xff]   ;;  %v3876_v24 = vld [vmem:[#allocation6 + $0x60] ss:$24 sps:$4 sm:$0xff]   ;;  %p4468_p10 = por %p4467_p9, %p4466_p8 }
  0x60   :  { %3797 = vmatpush3.bf16.msra.mxu0 %v3834_v6  ;;  %v3840_v23 = vld [vmem:[#allocation3] sm:$0xff]   ;;  %v3845_v25 = vld [vmem:[#allocation6 + $0x454] ss:$24 sps:$4 sm:$0xff]   ;;  %v3882_v27 = vld [vmem:[#allocation6 + $0x30] ss:$24 sps:$4 sm:$0xff]  }
  0x61   :  { %3798 = vmatprep.subr.bf16.mxu0 %v3835_v7  ;;  %2038 = vmatpush1.bf16.msra.mxu1 %v3852_v13  ;;  %v3877_v26 = vld [vmem:[#allocation6 + $0x34] ss:$24 sps:$4 sm:$0xff]   ;;  %v3883_v28 = vld [vmem:[#allocation6 + $0x4] ss:$24 sps:$4 sm:$0xff]   ;;  %v3888_v29 = vld [vmem:[#allocation6] ss:$24 sps:$4 sm:$0xff]   ;;  %p4469_p11 = pnand %p4468_p10, %p4462_p7 }
  0x62   :  { %2039 = vmatprep.subr.bf16.mxu1 %v3853_v14  ;;  %v3889_v30 = vld [vmem:[#allocation6 + $0x2d4] ss:$24 sps:$4 sm:$0xff]   ;;  %v3894_v31 = vld [vmem:[#allocation6 + $0x2d0] ss:$24 sps:$4 sm:$0xff]   ;;  %v3895_v32 = vld [vmem:[#allocation6 + $0x2a4] ss:$24 sps:$4 sm:$0xff]  }
  0x63   :  { %v3900_v33 = vld [vmem:[#allocation6 + $0x2a0] ss:$24 sps:$4 sm:$0xff]   ;;  %v3901_v34 = vld [vmem:[#allocation6 + $0x274] ss:$24 sps:$4 sm:$0xff]   ;;  %v3906_v35 = vld [vmem:[#allocation6 + $0x270] ss:$24 sps:$4 sm:$0xff]  }
  0x64   :  { %3799 = vmatpush3.bf16.msra.mxu0 %v3835_v7  ;;  %v3907_v36 = vld [vmem:[#allocation6 + $0x244] ss:$24 sps:$4 sm:$0xff]   ;;  %v3912_v37 = vld [vmem:[#allocation6 + $0x240] ss:$24 sps:$4 sm:$0xff]   ;;  %v3843_v44 = vld [vmem:[#allocation6 + $0x450] ss:$24 sps:$4 sm:$0xff]  }
  0x65   :  { %3800 = vmatprep.subr.bf16.mxu0 %v3836_v9  ;;  %2040 = vmatpush1.bf16.msra.mxu1 %v3858_v15  ;;  %v3851_v45 = vld [vmem:[#allocation6 + $0x424] ss:$24 sps:$4 sm:$0xff]   ;;  %v3849_v47 = vld [vmem:[#allocation6 + $0x420] ss:$24 sps:$4 sm:$0xff]   ;;  %v3857_v48 = vld [vmem:[#allocation6 + $0x3f4] ss:$24 sps:$4 sm:$0xff]  }
  0x66   :  { %2041 = vmatprep.subr.bf16.mxu1 %v3859_v16  ;;  %v3855_v49 = vld [vmem:[#allocation6 + $0x3f0] ss:$24 sps:$4 sm:$0xff]   ;;  %v3863_v50 = vld [vmem:[#allocation6 + $0x3c4] ss:$24 sps:$4 sm:$0xff]   ;;  %v3861_v51 = vld [vmem:[#allocation6 + $0x3c0] ss:$24 sps:$4 sm:$0xff]  }
  0x67   :  { %v3869_v52 = vld [vmem:[#allocation6 + $0x394] ss:$24 sps:$4 sm:$0xff]   ;;  %v3867_v53 = vld [vmem:[#allocation6 + $0x390] ss:$24 sps:$4 sm:$0xff]   ;;  %v3875_v54 = vld [vmem:[#allocation6 + $0x364] ss:$24 sps:$4 sm:$0xff]  }
  0x68   :  { %3801 = vmatpush3.bf16.msra.mxu0 %v3836_v9  ;;  %v3873_v55 = vld [vmem:[#allocation6 + $0x360] ss:$24 sps:$4 sm:$0xff]   ;;  %v3881_v56 = vld [vmem:[#allocation6 + $0x334] ss:$24 sps:$4 sm:$0xff]   ;;  %v3879_v57 = vld [vmem:[#allocation6 + $0x330] ss:$24 sps:$4 sm:$0xff]  }
  0x69   :  { %3802 = vmatprep.subr.bf16.mxu0 %v3837_v12  ;;  %2042 = vmatpush1.bf16.msra.mxu1 %v3864_v18  ;;  %v3887_v58 = vld [vmem:[#allocation6 + $0x304] ss:$24 sps:$4 sm:$0xff]   ;;  %v3885_v59 = vld [vmem:[#allocation6 + $0x300] ss:$24 sps:$4 sm:$0xff]   ;;  %v3893_v60 = vld [vmem:[#allocation6 + $0x5d4] ss:$24 sps:$4 sm:$0xff]  }
  0x6a   :  { %2043 = vmatprep.subr.bf16.mxu1 %v3865_v19  ;;  %v3891_v61 = vld [vmem:[#allocation6 + $0x5d0] ss:$24 sps:$4 sm:$0xff]   ;;  %v3899_v62 = vld [vmem:[#allocation6 + $0x5a4] ss:$24 sps:$4 sm:$0xff]   ;;  %v3897_v63 = vld [vmem:[#allocation6 + $0x5a0] ss:$24 sps:$4 sm:$0xff]  }
  0x6b   :  { %v3905_v0 = vld [vmem:[#allocation6 + $0x574] ss:$24 sps:$4 sm:$0xff]   ;;  %v3903_v1 = vld [vmem:[#allocation6 + $0x570] ss:$24 sps:$4 sm:$0xff]   ;;  %v3911_v2 = vld [vmem:[#allocation6 + $0x544] ss:$24 sps:$4 sm:$0xff]  }
  0x6c   :  { %3803 = vmatpush3.bf16.msra.mxu0 %v3837_v12  ;;  %v3909_v3 = vld [vmem:[#allocation6 + $0x540] ss:$24 sps:$4 sm:$0xff]   ;;  %v3913_v4 = vld [vmem:[#allocation6 + $0x214] ss:$24 sps:$4 sm:$0xff]   ;;  %v3915_v6 = vld [vmem:[#allocation6 + $0x510] ss:$24 sps:$4 sm:$0xff]  }
  0x6d   :  { %3804 = vmatprep.subr.bf16.mxu0 %v3838_v17  ;;  %2044 = vmatpush1.bf16.msra.mxu1 %v3870_v21  ;;  %v3917_v5 = vld [vmem:[#allocation6 + $0x514] ss:$24 sps:$4 sm:$0xff]   ;;  %v3918_v7 = vld [vmem:[#allocation6 + $0x210] ss:$24 sps:$4 sm:$0xff]   ;;  %v3919_v8 = vld [vmem:[#allocation6 + $0x1e4] ss:$24 sps:$4 sm:$0xff]  }
  0x6e   :  { %2045 = vmatprep.subr.bf16.mxu1 %v3871_v22  ;;  %v3923_v9 = vld [vmem:[#allocation6 + $0x4e4] ss:$24 sps:$4 sm:$0xff]   ;;  %v3921_v10 = vld [vmem:[#allocation6 + $0x4e0] ss:$24 sps:$4 sm:$0xff]   ;;  %v3925_v12 = vld [vmem:[#allocation6 + $0x1b4] ss:$24 sps:$4 sm:$0xff]  }
  0x6f   :  { %v3924_v11 = vld [vmem:[#allocation6 + $0x1e0] ss:$24 sps:$4 sm:$0xff]   ;;  %v3927_v13 = vld [vmem:[#allocation6 + $0x4b0] ss:$24 sps:$4 sm:$0xff]   ;;  %v3929_v14 = vld [vmem:[#allocation6 + $0x4b4] ss:$24 sps:$4 sm:$0xff]  }
  0x70   :  { %3805 = vmatpush3.bf16.msra.mxu0 %v3838_v17  ;;  %v4506_v15 = vmov 0.0   ;;  %v3930_v16 = vld [vmem:[#allocation6 + $0x1b0] ss:$24 sps:$4 sm:$0xff]   ;;  %v3931_v17 = vld [vmem:[#allocation6 + $0x184] ss:$24 sps:$4 sm:$0xff]  }
  0x71   :  { %3806 = vmatprep.subr.bf16.mxu0 %v3839_v20  ;;  %2046 = vmatpush1.bf16.msra.mxu1 %v3876_v24  ;;  %265 = vst [vmem:[#allocation2 + $0x20] sm:$0xff] %v4506_v15  ;;  %v3935_v18 = vld [vmem:[#allocation6 + $0x484] ss:$24 sps:$4 sm:$0xff]   ;;  %v3933_v19 = vld [vmem:[#allocation6 + $0x480] ss:$24 sps:$4 sm:$0xff]  }
  0x72   :  { %2047 = vmatprep.subr.bf16.mxu1 %v3877_v26  ;;  %v3939_v21 = vld [vmem:[#allocation6 + $0x754] ss:$24 sps:$4 sm:$0xff]   ;;  %v3979_v15 = vld [vmem:[#allocation6 + $0x600] ss:$24 sps:$4 sm:$0xff]  }
  0x73   :  { %v3942_v22 = vld [vmem:[#allocation6 + $0x15c] ss:$24 sps:$4 sm:$0xff]  }
  0x74   :  { %3807 = vmatpush3.bf16.msra.mxu0 %v3839_v20  ;;  %v3936_v20 = vld [vmem:[#allocation6 + $0x180] ss:$24 sps:$4 sm:$0xff]  }
  0x75   :  { %3808 = vmatprep.subr.bf16.mxu0 %v3840_v23  ;;  %2048 = vmatpush1.bf16.msra.mxu1 %v3882_v27  ;;  %v3937_v27 = vld [vmem:[#allocation6 + $0x750] ss:$24 sps:$4 sm:$0xff]  }
  0x76   :  { %2049 = vmatprep.subr.bf16.mxu1 %v3883_v28 }
  0x78   :  { %3809 = vmatpush3.bf16.msra.mxu0 %v3840_v23 }
  0x79   :  { %2088 = vmatprep.subr.bf16.mxu0 %v3845_v25  ;;  %2050 = vmatpush1.bf16.msra.mxu1 %v3888_v29 }
  0x7a   :  { %2051 = vmatprep.subr.bf16.mxu1 %v3889_v30 }
  0x7d   :  { %2052 = vmatpush2.bf16.msra.mxu1 %v3894_v31 }
  0x7e   :  { %2053 = vmatprep.subr.bf16.mxu1 %v3895_v32 }
  0x81   :  { %2054 = vmatpush2.bf16.msra.mxu1 %v3900_v33 }
  0x82   :  { %2055 = vmatprep.subr.bf16.mxu1 %v3901_v34 }
  0x85   :  { %2056 = vmatpush2.bf16.msra.mxu1 %v3906_v35 }
  0x86   :  { %2057 = vmatprep.subr.bf16.mxu1 %v3907_v36 }
  0x89   :  { %2058 = vmatpush2.bf16.msra.mxu1 %v3912_v37 }
  0x8a   :  { %2059 = vmatprep.subr.bf16.mxu1 %v3913_v4  ;;  %v3964_v4 = vld [vmem:[#allocation6 + $0x98] ss:$24 sps:$4 sm:$0xff]  }
  0x8d   :  { %2060 = vmatpush2.bf16.msra.mxu1 %v3918_v7  ;;  %v3967_v7 = vld [vmem:[#allocation6 + $0x660] ss:$24 sps:$4 sm:$0xff]  }
  0x8e   :  { %2061 = vmatprep.subr.bf16.mxu1 %v3919_v8  ;;  %v3970_v8 = vld [vmem:[#allocation6 + $0x68] ss:$24 sps:$4 sm:$0xff]  }
  0x91   :  { %2062 = vmatpush2.bf16.msra.mxu1 %v3924_v11  ;;  %v3973_v11 = vld [vmem:[#allocation6 + $0x630] ss:$24 sps:$4 sm:$0xff]  }
  0x92   :  { %2063 = vmatprep.subr.bf16.mxu1 %v3925_v12  ;;  %v3976_v12 = vld [vmem:[#allocation6 + $0x38] ss:$24 sps:$4 sm:$0xff]  }
  0x95   :  { %2064 = vmatpush2.bf16.msra.mxu1 %v3930_v16  ;;  %v3982_v16 = vld [vmem:[#allocation6 + $0x8] ss:$24 sps:$4 sm:$0xff]  }
  0x96   :  { %2065 = vmatprep.subr.bf16.mxu1 %v3931_v17  ;;  %v3987_v17 = vld [vmem:[#allocation6 + $0x8d4] ss:$24 sps:$4 sm:$0xff]  }
  0x99   :  { %2066 = vmatpush2.bf16.msra.mxu1 %v3936_v20  ;;  %v3988_v20 = vld [vmem:[#allocation6 + $0x2d8] ss:$24 sps:$4 sm:$0xff]  }
  0x9a   :  { %2141 = vmatprep.subr.bf16.mxu1 %v3939_v21  ;;  %v3993_v21 = vld [vmem:[#allocation6 + $0x8a4] ss:$24 sps:$4 sm:$0xff]  }
  0xd5   :  { %v134_v40 = vpop.permute.xlu1 %133  ;;  %v128_v41 = vpop.permute.xlu0 %127 }
  0xd6   :  { %vm140_vm0 = vcmp.eq.s32.totalorder %v134_v40, %v125_v39  ;;  %vm138_vm3 = vcmp.eq.s32.totalorder %v128_v41, %v125_v39 }
  0xd9   :  { %v137_v42 = vpop.permute.xlu1 %136  ;;  %v131_v43 = vpop.permute.xlu0 %130 }
  0xda   :  { %vm141_vm1 = vcmp.eq.s32.totalorder %v137_v42, %v125_v39  ;;  %vm139_vm2 = vcmp.eq.s32.totalorder %v131_v43, %v125_v39  ;;  %v3940_v39 = vld [vmem:[#allocation6 + $0x158] ss:$24 sps:$4 sm:$0xff]  }
  0xdb   :  { %vm3379_vm4 = vmpackc.low %vm141_vm1, %vm140_vm0 }
  0xdc   :  { %vm3377_vm5 = vmpackc.low %vm139_vm2, %vm138_vm3 }
  0xdd   :  { %3810 = vmatprep.mubr.msk.bf16.mxu0 %vm3377_vm5, %v4505_v46 }
  0xde   :  { %3811 = vmatmul.mubr.msk.bf16.vlgmr.msra.gmra.mxu0 %vm3379_vm4, %v4505_v46  ;;  %v3948_v46 = vld [vmem:[#allocation6 + $0x12c] ss:$24 sps:$4 sm:$0xff]  }
  0xdf   :  { %2089 = vmatpush1.bf16.msra.mxu0 %v3843_v44  ;;  %v3945_v44 = vld [vmem:[#allocation6 + $0x724] ss:$24 sps:$4 sm:$0xff]  }
  0xe0   :  { %2090 = vmatprep.subr.bf16.mxu0 %v3851_v45 }
  0xe3   :  { %2091 = vmatpush1.bf16.msra.mxu0 %v3849_v47 }
  0xe4   :  { %2092 = vmatprep.subr.bf16.mxu0 %v3857_v48  ;;  %v3943_v48 = vld [vmem:[#allocation6 + $0x720] ss:$24 sps:$4 sm:$0xff]  }
  0xe7   :  { %2093 = vmatpush1.bf16.msra.mxu0 %v3855_v49  ;;  %v3946_v49 = vld [vmem:[#allocation6 + $0x128] ss:$24 sps:$4 sm:$0xff]  }
  0xe8   :  { %2094 = vmatprep.subr.bf16.mxu0 %v3863_v50  ;;  %v3951_v50 = vld [vmem:[#allocation6 + $0x6f4] ss:$24 sps:$4 sm:$0xff]  }
  0xeb   :  { %2095 = vmatpush1.bf16.msra.mxu0 %v3861_v51  ;;  %v3954_v51 = vld [vmem:[#allocation6 + $0xfc] ss:$24 sps:$4 sm:$0xff]  }
  0xec   :  { %2096 = vmatprep.subr.bf16.mxu0 %v3869_v52 }
  0xef   :  { %2097 = vmatpush1.bf16.msra.mxu0 %v3867_v53 }
  0xf0   :  { %2098 = vmatprep.subr.bf16.mxu0 %v3875_v54  ;;  %v3949_v54 = vld [vmem:[#allocation6 + $0x6f0] ss:$24 sps:$4 sm:$0xff]  }
  0xf3   :  { %2099 = vmatpush1.bf16.msra.mxu0 %v3873_v55 }
  0xf4   :  { %2100 = vmatprep.subr.bf16.mxu0 %v3881_v56 }
  0xf7   :  { %2101 = vmatpush1.bf16.msra.mxu0 %v3879_v57  ;;  %v3952_v57 = vld [vmem:[#allocation6 + $0xf8] ss:$24 sps:$4 sm:$0xff]  }
  0xf8   :  { %2102 = vmatprep.subr.bf16.mxu0 %v3887_v58 }
  0xfb   :  { %2103 = vmatpush1.bf16.msra.mxu0 %v3885_v59 }
  0xfc   :  { %2104 = vmatprep.subr.bf16.mxu0 %v3893_v60  ;;  %v3957_v60 = vld [vmem:[#allocation6 + $0x6c4] ss:$24 sps:$4 sm:$0xff]  }
  0xff   :  { %2105 = vmatpush2.bf16.msra.mxu0 %v3891_v61 }
 0x100   :  { %2106 = vmatprep.subr.bf16.mxu0 %v3899_v62  ;;  %v3960_v62 = vld [vmem:[#allocation6 + $0xcc] ss:$24 sps:$4 sm:$0xff]  }
 0x103   :  { %2107 = vmatpush2.bf16.msra.mxu0 %v3897_v63  ;;  %v3955_v63 = vld [vmem:[#allocation6 + $0x6c0] ss:$24 sps:$4 sm:$0xff]  }
 0x104   :  { %2108 = vmatprep.subr.bf16.mxu0 %v3905_v0  ;;  %v3958_v0 = vld [vmem:[#allocation6 + $0xc8] ss:$24 sps:$4 sm:$0xff]  }
 0x107   :  { %2109 = vmatpush2.bf16.msra.mxu0 %v3903_v1  ;;  %v3963_v1 = vld [vmem:[#allocation6 + $0x694] ss:$24 sps:$4 sm:$0xff]  }
 0x108   :  { %2110 = vmatprep.subr.bf16.mxu0 %v3911_v2  ;;  %v3966_v2 = vld [vmem:[#allocation6 + $0x9c] ss:$24 sps:$4 sm:$0xff]  }
 0x10b   :  { %2111 = vmatpush2.bf16.msra.mxu0 %v3909_v3  ;;  %v3961_v3 = vld [vmem:[#allocation6 + $0x690] ss:$24 sps:$4 sm:$0xff]  }
 0x10c   :  { %2112 = vmatprep.subr.bf16.mxu0 %v3917_v5  ;;  %v3969_v5 = vld [vmem:[#allocation6 + $0x664] ss:$24 sps:$4 sm:$0xff]  }
 0x10f   :  { %2113 = vmatpush2.bf16.msra.mxu0 %v3915_v6  ;;  %v3972_v6 = vld [vmem:[#allocation6 + $0x6c] ss:$24 sps:$4 sm:$0xff]  }
 0x110   :  { %2114 = vmatprep.subr.bf16.mxu0 %v3923_v9  ;;  %v3975_v9 = vld [vmem:[#allocation6 + $0x634] ss:$24 sps:$4 sm:$0xff]  }
 0x113   :  { %2115 = vmatpush2.bf16.msra.mxu0 %v3921_v10  ;;  %v3978_v10 = vld [vmem:[#allocation6 + $0x3c] ss:$24 sps:$4 sm:$0xff]  }
 0x114   :  { %2116 = vmatprep.subr.bf16.mxu0 %v3929_v14  ;;  %v3984_v14 = vld [vmem:[#allocation6 + $0xc] ss:$24 sps:$4 sm:$0xff]  }
 0x117   :  { %2117 = vmatpush2.bf16.msra.mxu0 %v3927_v13  ;;  %v3981_v13 = vld [vmem:[#allocation6 + $0x604] ss:$24 sps:$4 sm:$0xff]  }
 0x118   :  { %2118 = vmatprep.subr.bf16.mxu0 %v3935_v18  ;;  %v3990_v18 = vld [vmem:[#allocation6 + $0x2dc] ss:$24 sps:$4 sm:$0xff]  }
 0x11b   :  { %2119 = vmatpush2.bf16.msra.mxu0 %v3933_v19  ;;  %v3985_v19 = vld [vmem:[#allocation6 + $0x8d0] ss:$24 sps:$4 sm:$0xff]  }
 0x11c   :  { %2194 = vmatprep.subr.bf16.mxu0 %v3942_v22  ;;  %v3996_v22 = vld [vmem:[#allocation6 + $0x2ac] ss:$24 sps:$4 sm:$0xff]  }
 0x19e   :  { %v3812_v23 = vpop.f32.mrf.mxu0 }
 0x19f   :  { %269 = vst [vmem:[#allocation2 + $0x10] sm:$0xff] %v3812_v23 }
 0x1a0   :  { %v250_v24 = vpop.f32.mrf.mxu0 }
 0x1a1   :  { %267 = vst [vmem:[#allocation2] sm:$0xff] %v250_v24 }
 0x1a2   :  { %v3813_v25 = vpop.f32.mrf.mxu0 }
 0x1a3   :  { %270 = vst [vmem:[#allocation2 + $0x18] sm:$0xff] %v3813_v25  ;;  %v4605_v58 = vpack.c.bf16 %v3813_v25, %v3812_v23  ;;  %v3991_v23 = vld [vmem:[#allocation6 + $0x8a0] ss:$24 sps:$4 sm:$0xff]   ;;  %v3999_v25 = vld [vmem:[#allocation6 + $0x874] ss:$24 sps:$4 sm:$0xff]  }
 0x1a4   :  { %v253_v26 = vpop.f32.mrf.mxu0 }
 0x1a5   :  { %268 = vst [vmem:[#allocation2 + $0x8] sm:$0xff] %v253_v26  ;;  %v4591_v40 = vpack.c.bf16 %v253_v26, %v250_v24  ;;  %v3994_v24 = vld [vmem:[#allocation6 + $0x2a8] ss:$24 sps:$4 sm:$0xff]   ;;  %v4002_v26 = vld [vmem:[#allocation6 + $0x27c] ss:$24 sps:$4 sm:$0xff]  }
 0x1aa   :  { %v277_v28 = vld [vmem:[#allocation2 + $0x11] sm:$0xff]  ;;  %v278_v29 = vld [vmem:[#allocation2 + $0x19] sm:$0xff] }
 0x1ab   :  { %v285_v42 = vld [vmem:[#allocation2 + $0x13] sm:$0xff]  ;;  %v286_v43 = vld [vmem:[#allocation2 + $0x1b] sm:$0xff]  ;;  %v4598_v45 = vpack.c.bf16 %v278_v29, %v277_v28 }
 0x1ac   :  { %v275_v30 = vld [vmem:[#allocation2 + $0x1] sm:$0xff]  ;;  %v276_v31 = vld [vmem:[#allocation2 + $0x9] sm:$0xff]  ;;  %v4601_v47 = vpack.c.bf16 %v286_v43, %v285_v42  ;;  %v281_v52 = vld [vmem:[#allocation2 + $0x12] sm:$0xff] }
 0x1ad   :  { %v283_v32 = vld [vmem:[#allocation2 + $0x3] sm:$0xff]  ;;  %v4587_v33 = vpack.c.bf16 %v276_v31, %v275_v30  ;;  %v284_v34 = vld [vmem:[#allocation2 + $0xb] sm:$0xff]  ;;  %v282_v53 = vld [vmem:[#allocation2 + $0x1a] sm:$0xff] }
 0x1ae   :  { %v279_v35 = vld [vmem:[#allocation2 + $0x2] sm:$0xff]  ;;  %v280_v36 = vld [vmem:[#allocation2 + $0xa] sm:$0xff]  ;;  %v4589_v37 = vpack.c.bf16 %v284_v34, %v283_v32  ;;  %v4607_v59 = vpack.c.bf16 %v282_v53, %v281_v52  ;;  %v4008_v30 = vld [vmem:[#allocation6 + $0x24c] ss:$24 sps:$4 sm:$0xff]  }
 0x1af   :  { %v4593_v41 = vpack.c.bf16 %v280_v36, %v279_v35  ;;  %2067 = vmatprep.mubr.bf16.mxu1 %v4587_v33  ;;  %v291_v55 = vld [vmem:[#allocation2 + $0x5] sm:$0xff]  ;;  %v292_v56 = vld [vmem:[#allocation2 + $0xd] sm:$0xff]  ;;  %v4009_v36 = vld [vmem:[#allocation6 + $0x810] ss:$24 sps:$4 sm:$0xff]  }
 0x1b0   :  { %2120 = vmatprep.mubr.bf16.mxu0 %v4589_v37  ;;  %2068 = vmatmul.mubr.bf16.vlgmr.msra.gmra.mxu1 %v4591_v40  ;;  %v4610_v61 = vpack.c.bf16 %v292_v56, %v291_v55  ;;  %v4000_v28 = vld [vmem:[#allocation6 + $0x278] ss:$24 sps:$4 sm:$0xff]   ;;  %v4005_v29 = vld [vmem:[#allocation6 + $0x844] ss:$24 sps:$4 sm:$0xff]   ;;  %v4006_v32 = vld [vmem:[#allocation6 + $0x248] ss:$24 sps:$4 sm:$0xff]  }
 0x1b1   :  { %2121 = vmatmul.mubr.bf16.vlgmr.msra.gmra.mxu0 %v4593_v41  ;;  %2142 = vmatpush1.bf16.msra.mxu1 %v3937_v27  ;;  %v3997_v27 = vld [vmem:[#allocation6 + $0x870] ss:$24 sps:$4 sm:$0xff]   ;;  %v4003_v31 = vld [vmem:[#allocation6 + $0x840] ss:$24 sps:$4 sm:$0xff]   ;;  %v4011_v34 = vld [vmem:[#allocation6 + $0x814] ss:$24 sps:$4 sm:$0xff]  }
 0x1b2   :  { %2195 = vmatpush1.bf16.msra.mxu0 %v3940_v39  ;;  %2077 = vmatprep.mubr.bf16.mxu1 %v4598_v45  ;;  %v4014_v35 = vld [vmem:[#allocation6 + $0x21c] ss:$24 sps:$4 sm:$0xff]   ;;  %v4012_v39 = vld [vmem:[#allocation6 + $0x218] ss:$24 sps:$4 sm:$0xff]   ;;  %v4020_v43 = vld [vmem:[#allocation6 + $0x1ec] ss:$24 sps:$4 sm:$0xff]  }
 0x1b3   :  { %2130 = vmatprep.mubr.bf16.mxu0 %v4601_v47  ;;  %2143 = vmatprep.subr.bf16.mxu1 %v3945_v44  ;;  %v4017_v42 = vld [vmem:[#allocation6 + $0x7e4] ss:$24 sps:$4 sm:$0xff]   ;;  %v4015_v44 = vld [vmem:[#allocation6 + $0x7e0] ss:$24 sps:$4 sm:$0xff]  }
 0x1b4   :  { %2196 = vmatprep.subr.bf16.mxu0 %v3948_v46  ;;  %v4018_v46 = vld [vmem:[#allocation6 + $0x1e8] ss:$24 sps:$4 sm:$0xff]   ;;  %v4029_v52 = vld [vmem:[#allocation6 + $0x784] ss:$24 sps:$4 sm:$0xff]  }
 0x1b5   :  { %2144 = vmatpush1.bf16.msra.mxu1 %v3943_v48  ;;  %v4023_v48 = vld [vmem:[#allocation6 + $0x7b4] ss:$24 sps:$4 sm:$0xff]   ;;  %v4030_v55 = vld [vmem:[#allocation6 + $0x188] ss:$24 sps:$4 sm:$0xff]  }
 0x1b6   :  { %2197 = vmatpush1.bf16.msra.mxu0 %v3946_v49  ;;  %2145 = vmatprep.subr.bf16.mxu1 %v3951_v50  ;;  %v4026_v49 = vld [vmem:[#allocation6 + $0x1bc] ss:$24 sps:$4 sm:$0xff]   ;;  %v4021_v50 = vld [vmem:[#allocation6 + $0x7b0] ss:$24 sps:$4 sm:$0xff]   ;;  %v4032_v53 = vld [vmem:[#allocation6 + $0x18c] ss:$24 sps:$4 sm:$0xff]  }
 0x1b7   :  { %2198 = vmatprep.subr.bf16.mxu0 %v3954_v51  ;;  %v4024_v51 = vld [vmem:[#allocation6 + $0x1b8] ss:$24 sps:$4 sm:$0xff]   ;;  %v4035_v56 = vld [vmem:[#allocation6 + $0x45c] ss:$24 sps:$4 sm:$0xff]  }
 0x1b8   :  { %2078 = vmatmul.mubr.bf16.gmra.mxu1 %v4605_v58 }
 0x1b9   :  { %2131 = vmatmul.mubr.bf16.gmra.mxu0 %v4607_v59  ;;  %2146 = vmatpush1.bf16.msra.mxu1 %v3949_v54  ;;  %v4027_v54 = vld [vmem:[#allocation6 + $0x780] ss:$24 sps:$4 sm:$0xff]  }
 0x1ba   :  { %2199 = vmatpush1.bf16.msra.mxu0 %v3952_v57  ;;  %2173 = vmatprep.mubr.bf16.mxu1 %v4610_v61  ;;  %v287_v57 = vld [vmem:[#allocation2 + $0x4] sm:$0xff] }
 0x1bb   :  { %2226 = vmatprep.mubr.bf16.mxu0 %v4587_v33  ;;  %2147 = vmatprep.subr.bf16.mxu1 %v3957_v60  ;;  %v288_v60 = vld [vmem:[#allocation2 + $0xc] sm:$0xff] }
 0x1bc   :  { %2200 = vmatprep.subr.bf16.mxu0 %v3960_v62  ;;  %v4038_v62 = vld [vmem:[#allocation6 + $0x75c] ss:$24 sps:$4 sm:$0xff]  }
 0x1bd   :  { %2148 = vmatpush1.bf16.msra.mxu1 %v3955_v63  ;;  %v293_v63 = vld [vmem:[#allocation2 + $0x15] sm:$0xff] }
 0x1be   :  { %2201 = vmatpush1.bf16.msra.mxu0 %v3958_v0  ;;  %2149 = vmatprep.subr.bf16.mxu1 %v3963_v1  ;;  %v294_v0 = vld [vmem:[#allocation2 + $0x1d] sm:$0xff]  ;;  %v4615_v1 = vpack.c.bf16 %v288_v60, %v287_v57  ;;  %v4099_v57 = vld [vmem:[#allocation6 + $0x548] ss:$24 sps:$4 sm:$0xff]  }
 0x1bf   :  { %2202 = vmatprep.subr.bf16.mxu0 %v3966_v2  ;;  %v4033_v2 = vld [vmem:[#allocation6 + $0x458] ss:$24 sps:$4 sm:$0xff]   ;;  %v4102_v60 = vld [vmem:[#allocation6 + $0x848] ss:$24 sps:$4 sm:$0xff]  }
 0x1c1   :  { %2150 = vmatpush1.bf16.msra.mxu1 %v3961_v3  ;;  %v4036_v3 = vld [vmem:[#allocation6 + $0x758] ss:$24 sps:$4 sm:$0xff]  }
 0x1c2   :  { %2203 = vmatpush1.bf16.msra.mxu0 %v3964_v4  ;;  %2151 = vmatprep.subr.bf16.mxu1 %v3969_v5  ;;  %v4617_v4 = vpack.c.bf16 %v294_v0, %v293_v63  ;;  %v4041_v5 = vld [vmem:[#allocation6 + $0x42c] ss:$24 sps:$4 sm:$0xff]   ;;  %v4110_v63 = vld [vmem:[#allocation6 + $0x81c] ss:$24 sps:$4 sm:$0xff]   ;;  %v4105_v0 = vld [vmem:[#allocation6 + $0x518] ss:$24 sps:$4 sm:$0xff]  }
 0x1c3   :  { %2204 = vmatprep.subr.bf16.mxu0 %v3972_v6  ;;  %v4044_v6 = vld [vmem:[#allocation6 + $0x72c] ss:$24 sps:$4 sm:$0xff]  }
 0x1c5   :  { %2152 = vmatpush1.bf16.msra.mxu1 %v3967_v7  ;;  %v4039_v7 = vld [vmem:[#allocation6 + $0x428] ss:$24 sps:$4 sm:$0xff]  }
 0x1c6   :  { %2205 = vmatpush1.bf16.msra.mxu0 %v3970_v8  ;;  %2153 = vmatprep.subr.bf16.mxu1 %v3975_v9  ;;  %v4042_v8 = vld [vmem:[#allocation6 + $0x728] ss:$24 sps:$4 sm:$0xff]  }
 0x1c7   :  { %2206 = vmatprep.subr.bf16.mxu0 %v3978_v10  ;;  %v289_v9 = vld [vmem:[#allocation2 + $0x14] sm:$0xff]  ;;  %v290_v10 = vld [vmem:[#allocation2 + $0x1c] sm:$0xff] }
 0x1c9   :  { %2154 = vmatpush1.bf16.msra.mxu1 %v3973_v11  ;;  %v4047_v11 = vld [vmem:[#allocation6 + $0x3fc] ss:$24 sps:$4 sm:$0xff]  }
 0x1ca   :  { %2207 = vmatpush1.bf16.msra.mxu0 %v3976_v12  ;;  %2155 = vmatprep.subr.bf16.mxu1 %v3981_v13  ;;  %v4050_v12 = vld [vmem:[#allocation6 + $0x6fc] ss:$24 sps:$4 sm:$0xff]   ;;  %v4623_v13 = vpack.c.bf16 %v290_v10, %v289_v9  ;;  %v4117_v10 = vld [vmem:[#allocation6 + $0x4b8] ss:$24 sps:$4 sm:$0xff]  }
 0x1cb   :  { %2208 = vmatprep.subr.bf16.mxu0 %v3984_v14  ;;  %v4045_v14 = vld [vmem:[#allocation6 + $0x3f8] ss:$24 sps:$4 sm:$0xff]   ;;  %v4122_v9 = vld [vmem:[#allocation6 + $0x7bc] ss:$24 sps:$4 sm:$0xff]  }
 0x1cd   :  { %2156 = vmatpush1.bf16.msra.mxu1 %v3979_v15  ;;  %v4048_v15 = vld [vmem:[#allocation6 + $0x6f8] ss:$24 sps:$4 sm:$0xff]  }
 0x1ce   :  { %2209 = vmatpush1.bf16.msra.mxu0 %v3982_v16  ;;  %2157 = vmatprep.subr.bf16.mxu1 %v3987_v17  ;;  %v4053_v16 = vld [vmem:[#allocation6 + $0x3cc] ss:$24 sps:$4 sm:$0xff]  }
 0x1cf   :  { %2210 = vmatprep.subr.bf16.mxu0 %v3990_v18  ;;  %v4056_v17 = vld [vmem:[#allocation6 + $0x6cc] ss:$24 sps:$4 sm:$0xff]   ;;  %v4051_v18 = vld [vmem:[#allocation6 + $0x3c8] ss:$24 sps:$4 sm:$0xff]  }
 0x1d1   :  { %2158 = vmatpush2.bf16.msra.mxu1 %v3985_v19  ;;  %v4054_v19 = vld [vmem:[#allocation6 + $0x6c8] ss:$24 sps:$4 sm:$0xff]  }
 0x1d2   :  { %2211 = vmatpush2.bf16.msra.mxu0 %v3988_v20  ;;  %2159 = vmatprep.subr.bf16.mxu1 %v3993_v21  ;;  %v4059_v20 = vld [vmem:[#allocation6 + $0x39c] ss:$24 sps:$4 sm:$0xff]  }
 0x1d3   :  { %2212 = vmatprep.subr.bf16.mxu0 %v3996_v22  ;;  %v4062_v21 = vld [vmem:[#allocation6 + $0x69c] ss:$24 sps:$4 sm:$0xff]   ;;  %v4057_v22 = vld [vmem:[#allocation6 + $0x398] ss:$24 sps:$4 sm:$0xff]  }
 0x1d5   :  { %2160 = vmatpush2.bf16.msra.mxu1 %v3991_v23  ;;  %v4060_v23 = vld [vmem:[#allocation6 + $0x698] ss:$24 sps:$4 sm:$0xff]  }
 0x1d6   :  { %2213 = vmatpush2.bf16.msra.mxu0 %v3994_v24  ;;  %2161 = vmatprep.subr.bf16.mxu1 %v3999_v25  ;;  %v4065_v24 = vld [vmem:[#allocation6 + $0x36c] ss:$24 sps:$4 sm:$0xff]  }
 0x1d7   :  { %2214 = vmatprep.subr.bf16.mxu0 %v4002_v26  ;;  %v4068_v25 = vld [vmem:[#allocation6 + $0x66c] ss:$24 sps:$4 sm:$0xff]   ;;  %v4063_v26 = vld [vmem:[#allocation6 + $0x368] ss:$24 sps:$4 sm:$0xff]  }
 0x1d9   :  { %2162 = vmatpush2.bf16.msra.mxu1 %v3997_v27  ;;  %v4066_v27 = vld [vmem:[#allocation6 + $0x668] ss:$24 sps:$4 sm:$0xff]  }
 0x1da   :  { %2215 = vmatpush2.bf16.msra.mxu0 %v4000_v28  ;;  %2163 = vmatprep.subr.bf16.mxu1 %v4005_v29  ;;  %v4071_v28 = vld [vmem:[#allocation6 + $0x33c] ss:$24 sps:$4 sm:$0xff]  }
 0x1db   :  { %2216 = vmatprep.subr.bf16.mxu0 %v4008_v30  ;;  %v4074_v29 = vld [vmem:[#allocation6 + $0x63c] ss:$24 sps:$4 sm:$0xff]   ;;  %v4069_v30 = vld [vmem:[#allocation6 + $0x338] ss:$24 sps:$4 sm:$0xff]  }
 0x1dd   :  { %2164 = vmatpush2.bf16.msra.mxu1 %v4003_v31  ;;  %v4072_v31 = vld [vmem:[#allocation6 + $0x638] ss:$24 sps:$4 sm:$0xff]  }
 0x1de   :  { %2217 = vmatpush2.bf16.msra.mxu0 %v4006_v32  ;;  %2165 = vmatprep.subr.bf16.mxu1 %v4011_v34  ;;  %v4077_v32 = vld [vmem:[#allocation6 + $0x30c] ss:$24 sps:$4 sm:$0xff]  }
 0x1df   :  { %2218 = vmatprep.subr.bf16.mxu0 %v4014_v35  ;;  %v4080_v34 = vld [vmem:[#allocation6 + $0x60c] ss:$24 sps:$4 sm:$0xff]   ;;  %v4075_v35 = vld [vmem:[#allocation6 + $0x308] ss:$24 sps:$4 sm:$0xff]  }
 0x1e1   :  { %2166 = vmatpush2.bf16.msra.mxu1 %v4009_v36  ;;  %v4078_v36 = vld [vmem:[#allocation6 + $0x608] ss:$24 sps:$4 sm:$0xff]  }
 0x1e2   :  { %2219 = vmatpush2.bf16.msra.mxu0 %v4012_v39  ;;  %2167 = vmatprep.subr.bf16.mxu1 %v4017_v42  ;;  %v4083_v39 = vld [vmem:[#allocation6 + $0x5dc] ss:$24 sps:$4 sm:$0xff]  }
 0x1e3   :  { %2220 = vmatprep.subr.bf16.mxu0 %v4020_v43  ;;  %v4086_v42 = vld [vmem:[#allocation6 + $0x8dc] ss:$24 sps:$4 sm:$0xff]   ;;  %v4081_v43 = vld [vmem:[#allocation6 + $0x5d8] ss:$24 sps:$4 sm:$0xff]  }
 0x1e5   :  { %2168 = vmatpush2.bf16.msra.mxu1 %v4015_v44  ;;  %v4084_v44 = vld [vmem:[#allocation6 + $0x8d8] ss:$24 sps:$4 sm:$0xff]  }
 0x1e6   :  { %2221 = vmatpush2.bf16.msra.mxu0 %v4018_v46  ;;  %2169 = vmatprep.subr.bf16.mxu1 %v4023_v48  ;;  %v4089_v46 = vld [vmem:[#allocation6 + $0x5ac] ss:$24 sps:$4 sm:$0xff]  }
 0x1e7   :  { %2222 = vmatprep.subr.bf16.mxu0 %v4026_v49  ;;  %v4092_v48 = vld [vmem:[#allocation6 + $0x8ac] ss:$24 sps:$4 sm:$0xff]   ;;  %v4087_v49 = vld [vmem:[#allocation6 + $0x5a8] ss:$24 sps:$4 sm:$0xff]  }
 0x1e9   :  { %2170 = vmatpush2.bf16.msra.mxu1 %v4021_v50  ;;  %v4090_v50 = vld [vmem:[#allocation6 + $0x8a8] ss:$24 sps:$4 sm:$0xff]  }
 0x1ea   :  { %2223 = vmatpush2.bf16.msra.mxu0 %v4024_v51  ;;  %2171 = vmatprep.subr.bf16.mxu1 %v4029_v52  ;;  %v4095_v51 = vld [vmem:[#allocation6 + $0x57c] ss:$24 sps:$4 sm:$0xff]  }
 0x1eb   :  { %2224 = vmatprep.subr.bf16.mxu0 %v4032_v53  ;;  %v4098_v52 = vld [vmem:[#allocation6 + $0x87c] ss:$24 sps:$4 sm:$0xff]   ;;  %v4093_v53 = vld [vmem:[#allocation6 + $0x578] ss:$24 sps:$4 sm:$0xff]  }
 0x1ed   :  { %2172 = vmatpush2.bf16.msra.mxu1 %v4027_v54  ;;  %v4096_v54 = vld [vmem:[#allocation6 + $0x878] ss:$24 sps:$4 sm:$0xff]  }
 0x1ee   :  { %2225 = vmatpush2.bf16.msra.mxu0 %v4030_v55  ;;  %2247 = vmatprep.subr.bf16.mxu1 %v4035_v56  ;;  %v4101_v55 = vld [vmem:[#allocation6 + $0x54c] ss:$24 sps:$4 sm:$0xff]  }
 0x1ef   :  { %2300 = vmatprep.subr.bf16.mxu0 %v4038_v62  ;;  %v4104_v56 = vld [vmem:[#allocation6 + $0x84c] ss:$24 sps:$4 sm:$0xff]   ;;  %v4107_v62 = vld [vmem:[#allocation6 + $0x51c] ss:$24 sps:$4 sm:$0xff]  }
 0x1f0   :  { %2174 = vmatmul.mubr.bf16.vlgmr.msra.gmra.mxu1 %v4615_v1 }
 0x1f1   :  { %2227 = vmatmul.mubr.bf16.vlgmr.msra.gmra.mxu0 %v4591_v40  ;;  %2183 = vmatprep.mubr.bf16.mxu1 %v4617_v4 }
 0x1f2   :  { %2236 = vmatprep.mubr.bf16.mxu0 %v4598_v45  ;;  %2248 = vmatpush1.bf16.msra.mxu1 %v4033_v2  ;;  %v4108_v2 = vld [vmem:[#allocation6 + $0x818] ss:$24 sps:$4 sm:$0xff]  }
 0x1f3   :  { %2301 = vmatpush1.bf16.msra.mxu0 %v4036_v3  ;;  %2249 = vmatprep.subr.bf16.mxu1 %v4041_v5  ;;  %v4113_v3 = vld [vmem:[#allocation6 + $0x4ec] ss:$24 sps:$4 sm:$0xff]  }
 0x1f4   :  { %2302 = vmatprep.subr.bf16.mxu0 %v4044_v6  ;;  %v4116_v5 = vld [vmem:[#allocation6 + $0x7ec] ss:$24 sps:$4 sm:$0xff]   ;;  %v4111_v6 = vld [vmem:[#allocation6 + $0x4e8] ss:$24 sps:$4 sm:$0xff]  }
 0x1f6   :  { %2250 = vmatpush1.bf16.msra.mxu1 %v4039_v7  ;;  %v4114_v7 = vld [vmem:[#allocation6 + $0x7e8] ss:$24 sps:$4 sm:$0xff]  }
 0x1f7   :  { %2303 = vmatpush1.bf16.msra.mxu0 %v4042_v8  ;;  %2251 = vmatprep.subr.bf16.mxu1 %v4047_v11  ;;  %v4119_v8 = vld [vmem:[#allocation6 + $0x4bc] ss:$24 sps:$4 sm:$0xff]   ;;  %v4120_v11 = vld [vmem:[#allocation6 + $0x7b8] ss:$24 sps:$4 sm:$0xff]  }
 0x1f8   :  { %2184 = vmatmul.mubr.bf16.gmra.mxu1 %v4623_v13  ;;  %2304 = vmatprep.subr.bf16.mxu0 %v4050_v12  ;;  %v4125_v12 = vld [vmem:[#allocation6 + $0x48c] ss:$24 sps:$4 sm:$0xff]  }
 0x1f9   :  { %2237 = vmatmul.mubr.bf16.gmra.mxu0 %v4605_v58  ;;  %2279 = vmatprep.mubr.bf16.mxu1 %v4589_v37 }
 0x1fa   :  { %2252 = vmatpush1.bf16.msra.mxu1 %v4045_v14  ;;  %2332 = vmatprep.mubr.bf16.mxu0 %v4610_v61  ;;  %v4128_v14 = vld [vmem:[#allocation6 + $0x78c] ss:$24 sps:$4 sm:$0xff]  }
 0x1fb   :  { %2305 = vmatpush1.bf16.msra.mxu0 %v4048_v15  ;;  %2253 = vmatprep.subr.bf16.mxu1 %v4053_v16  ;;  %v4123_v15 = vld [vmem:[#allocation6 + $0x488] ss:$24 sps:$4 sm:$0xff]  }
 0x1fc   :  { %2306 = vmatprep.subr.bf16.mxu0 %v4056_v17  ;;  %v4126_v16 = vld [vmem:[#allocation6 + $0x788] ss:$24 sps:$4 sm:$0xff]   ;;  %v4131_v17 = vld [vmem:[#allocation6 + $0x164] ss:$24 sps:$4 sm:$0xff]  }
 0x1fe   :  { %2254 = vmatpush1.bf16.msra.mxu1 %v4051_v18  ;;  %v4134_v18 = vld [vmem:[#allocation6 + $0x464] ss:$24 sps:$4 sm:$0xff]  }
 0x1ff   :  { %2307 = vmatpush1.bf16.msra.mxu0 %v4054_v19  ;;  %2255 = vmatprep.subr.bf16.mxu1 %v4059_v20  ;;  %v4129_v19 = vld [vmem:[#allocation6 + $0x160] ss:$24 sps:$4 sm:$0xff]  }
 0x200   :  { %2308 = vmatprep.subr.bf16.mxu0 %v4062_v21  ;;  %v4132_v20 = vld [vmem:[#allocation6 + $0x460] ss:$24 sps:$4 sm:$0xff]   ;;  %v4137_v21 = vld [vmem:[#allocation6 + $0x134] ss:$24 sps:$4 sm:$0xff]  }
 0x202   :  { %2256 = vmatpush1.bf16.msra.mxu1 %v4057_v22  ;;  %v4140_v22 = vld [vmem:[#allocation6 + $0x434] ss:$24 sps:$4 sm:$0xff]  }
 0x203   :  { %2309 = vmatpush1.bf16.msra.mxu0 %v4060_v23  ;;  %2257 = vmatprep.subr.bf16.mxu1 %v4065_v24  ;;  %v4135_v23 = vld [vmem:[#allocation6 + $0x130] ss:$24 sps:$4 sm:$0xff]  }
 0x204   :  { %2310 = vmatprep.subr.bf16.mxu0 %v4068_v25  ;;  %v4138_v24 = vld [vmem:[#allocation6 + $0x430] ss:$24 sps:$4 sm:$0xff]   ;;  %v4143_v25 = vld [vmem:[#allocation6 + $0x104] ss:$24 sps:$4 sm:$0xff]  }
 0x206   :  { %2258 = vmatpush1.bf16.msra.mxu1 %v4063_v26  ;;  %v4146_v26 = vld [vmem:[#allocation6 + $0x404] ss:$24 sps:$4 sm:$0xff]  }
 0x207   :  { %2311 = vmatpush1.bf16.msra.mxu0 %v4066_v27  ;;  %2259 = vmatprep.subr.bf16.mxu1 %v4071_v28  ;;  %v4141_v27 = vld [vmem:[#allocation6 + $0x100] ss:$24 sps:$4 sm:$0xff]  }
 0x208   :  { %2312 = vmatprep.subr.bf16.mxu0 %v4074_v29  ;;  %v4144_v28 = vld [vmem:[#allocation6 + $0x400] ss:$24 sps:$4 sm:$0xff]   ;;  %v4149_v29 = vld [vmem:[#allocation6 + $0xd4] ss:$24 sps:$4 sm:$0xff]  }
 0x20a   :  { %2260 = vmatpush1.bf16.msra.mxu1 %v4069_v30  ;;  %v4152_v30 = vld [vmem:[#allocation6 + $0x3d4] ss:$24 sps:$4 sm:$0xff]  }
 0x20b   :  { %2313 = vmatpush1.bf16.msra.mxu0 %v4072_v31  ;;  %2261 = vmatprep.subr.bf16.mxu1 %v4077_v32  ;;  %v4147_v31 = vld [vmem:[#allocation6 + $0xd0] ss:$24 sps:$4 sm:$0xff]  }
 0x20c   :  { %2314 = vmatprep.subr.bf16.mxu0 %v4080_v34  ;;  %v4150_v32 = vld [vmem:[#allocation6 + $0x3d0] ss:$24 sps:$4 sm:$0xff]   ;;  %v4155_v34 = vld [vmem:[#allocation6 + $0xa4] ss:$24 sps:$4 sm:$0xff]  }
 0x20e   :  { %2262 = vmatpush1.bf16.msra.mxu1 %v4075_v35  ;;  %v4158_v35 = vld [vmem:[#allocation6 + $0x3a4] ss:$24 sps:$4 sm:$0xff]  }
 0x20f   :  { %2315 = vmatpush1.bf16.msra.mxu0 %v4078_v36  ;;  %2263 = vmatprep.subr.bf16.mxu1 %v4083_v39  ;;  %v4153_v36 = vld [vmem:[#allocation6 + $0xa0] ss:$24 sps:$4 sm:$0xff]  }
 0x210   :  { %2316 = vmatprep.subr.bf16.mxu0 %v4086_v42  ;;  %v4156_v39 = vld [vmem:[#allocation6 + $0x3a0] ss:$24 sps:$4 sm:$0xff]   ;;  %v4161_v42 = vld [vmem:[#allocation6 + $0x74] ss:$24 sps:$4 sm:$0xff]  }
 0x212   :  { %2264 = vmatpush2.bf16.msra.mxu1 %v4081_v43  ;;  %v4164_v43 = vld [vmem:[#allocation6 + $0x374] ss:$24 sps:$4 sm:$0xff]  }
 0x213   :  { %2317 = vmatpush2.bf16.msra.mxu0 %v4084_v44  ;;  %2265 = vmatprep.subr.bf16.mxu1 %v4089_v46  ;;  %v4167_v44 = vld [vmem:[#allocation6 + $0x44] ss:$24 sps:$4 sm:$0xff]  }
 0x214   :  { %2318 = vmatprep.subr.bf16.mxu0 %v4092_v48  ;;  %v4170_v46 = vld [vmem:[#allocation6 + $0x344] ss:$24 sps:$4 sm:$0xff]   ;;  %v4165_v48 = vld [vmem:[#allocation6 + $0x40] ss:$24 sps:$4 sm:$0xff]  }
 0x216   :  { %2266 = vmatpush2.bf16.msra.mxu1 %v4087_v49  ;;  %v4168_v49 = vld [vmem:[#allocation6 + $0x340] ss:$24 sps:$4 sm:$0xff]  }
 0x217   :  { %2319 = vmatpush2.bf16.msra.mxu0 %v4090_v50  ;;  %2267 = vmatprep.subr.bf16.mxu1 %v4095_v51  ;;  %v4173_v50 = vld [vmem:[#allocation6 + $0x14] ss:$24 sps:$4 sm:$0xff]  }
 0x218   :  { %2320 = vmatprep.subr.bf16.mxu0 %v4098_v52  ;;  %v4176_v51 = vld [vmem:[#allocation6 + $0x314] ss:$24 sps:$4 sm:$0xff]   ;;  %v4171_v52 = vld [vmem:[#allocation6 + $0x10] ss:$24 sps:$4 sm:$0xff]  }
 0x21a   :  { %2268 = vmatpush2.bf16.msra.mxu1 %v4093_v53  ;;  %v4174_v53 = vld [vmem:[#allocation6 + $0x310] ss:$24 sps:$4 sm:$0xff]  }
 0x21b   :  { %2321 = vmatpush2.bf16.msra.mxu0 %v4096_v54  ;;  %2269 = vmatprep.subr.bf16.mxu1 %v4101_v55  ;;  %v4179_v54 = vld [vmem:[#allocation6 + $0x2e4] ss:$24 sps:$4 sm:$0xff]  }
 0x21c   :  { %2322 = vmatprep.subr.bf16.mxu0 %v4104_v56  ;;  %v4182_v55 = vld [vmem:[#allocation6 + $0x5e4] ss:$24 sps:$4 sm:$0xff]   ;;  %v4177_v56 = vld [vmem:[#allocation6 + $0x2e0] ss:$24 sps:$4 sm:$0xff]  }
 0x21e   :  { %2270 = vmatpush2.bf16.msra.mxu1 %v4099_v57  ;;  %v4180_v57 = vld [vmem:[#allocation6 + $0x5e0] ss:$24 sps:$4 sm:$0xff]  }
 0x21f   :  { %2323 = vmatpush2.bf16.msra.mxu0 %v4102_v60  ;;  %2271 = vmatprep.subr.bf16.mxu1 %v4107_v62  ;;  %v4185_v60 = vld [vmem:[#allocation6 + $0x2b4] ss:$24 sps:$4 sm:$0xff]  }
 0x220   :  { %2324 = vmatprep.subr.bf16.mxu0 %v4110_v63  ;;  %v4188_v62 = vld [vmem:[#allocation6 + $0x5b4] ss:$24 sps:$4 sm:$0xff]   ;;  %v4183_v63 = vld [vmem:[#allocation6 + $0x2b0] ss:$24 sps:$4 sm:$0xff]  }
 0x222   :  { %2272 = vmatpush2.bf16.msra.mxu1 %v4105_v0  ;;  %v4186_v0 = vld [vmem:[#allocation6 + $0x5b0] ss:$24 sps:$4 sm:$0xff]  }
 0x223   :  { %2325 = vmatpush2.bf16.msra.mxu0 %v4108_v2  ;;  %2273 = vmatprep.subr.bf16.mxu1 %v4113_v3  ;;  %v4191_v2 = vld [vmem:[#allocation6 + $0x284] ss:$24 sps:$4 sm:$0xff]  }
 0x224   :  { %2326 = vmatprep.subr.bf16.mxu0 %v4116_v5  ;;  %v4194_v3 = vld [vmem:[#allocation6 + $0x584] ss:$24 sps:$4 sm:$0xff]   ;;  %v4189_v5 = vld [vmem:[#allocation6 + $0x280] ss:$24 sps:$4 sm:$0xff]  }
 0x226   :  { %2274 = vmatpush2.bf16.msra.mxu1 %v4111_v6  ;;  %v4192_v6 = vld [vmem:[#allocation6 + $0x580] ss:$24 sps:$4 sm:$0xff]  }
 0x227   :  { %2327 = vmatpush2.bf16.msra.mxu0 %v4114_v7  ;;  %2275 = vmatprep.subr.bf16.mxu1 %v4119_v8  ;;  %v4197_v7 = vld [vmem:[#allocation6 + $0x254] ss:$24 sps:$4 sm:$0xff]  }
 0x228   :  { %2328 = vmatprep.subr.bf16.mxu0 %v4122_v9  ;;  %v4200_v8 = vld [vmem:[#allocation6 + $0x554] ss:$24 sps:$4 sm:$0xff]   ;;  %v4195_v9 = vld [vmem:[#allocation6 + $0x250] ss:$24 sps:$4 sm:$0xff]  }
 0x22a   :  { %2276 = vmatpush2.bf16.msra.mxu1 %v4117_v10  ;;  %v4198_v10 = vld [vmem:[#allocation6 + $0x550] ss:$24 sps:$4 sm:$0xff]  }
 0x22b   :  { %2329 = vmatpush2.bf16.msra.mxu0 %v4120_v11  ;;  %2277 = vmatprep.subr.bf16.mxu1 %v4125_v12  ;;  %v4203_v11 = vld [vmem:[#allocation6 + $0x224] ss:$24 sps:$4 sm:$0xff]  }
 0x22c   :  { %2330 = vmatprep.subr.bf16.mxu0 %v4128_v14  ;;  %v4206_v12 = vld [vmem:[#allocation6 + $0x524] ss:$24 sps:$4 sm:$0xff]   ;;  %v4201_v14 = vld [vmem:[#allocation6 + $0x220] ss:$24 sps:$4 sm:$0xff]  }
 0x22e   :  { %2278 = vmatpush2.bf16.msra.mxu1 %v4123_v15  ;;  %v4204_v15 = vld [vmem:[#allocation6 + $0x520] ss:$24 sps:$4 sm:$0xff]  }
 0x22f   :  { %2331 = vmatpush2.bf16.msra.mxu0 %v4126_v16  ;;  %2353 = vmatprep.subr.bf16.mxu1 %v4131_v17  ;;  %v4209_v16 = vld [vmem:[#allocation6 + $0x1f4] ss:$24 sps:$4 sm:$0xff]  }
 0x230   :  { %2406 = vmatprep.subr.bf16.mxu0 %v4134_v18  ;;  %v4212_v17 = vld [vmem:[#allocation6 + $0x4f4] ss:$24 sps:$4 sm:$0xff]   ;;  %v4207_v18 = vld [vmem:[#allocation6 + $0x1f0] ss:$24 sps:$4 sm:$0xff]  }
 0x231   :  { %2280 = vmatmul.mubr.bf16.vlgmr.msra.gmra.mxu1 %v4593_v41 }
 0x232   :  { %2333 = vmatmul.mubr.bf16.vlgmr.msra.gmra.mxu0 %v4615_v1  ;;  %2289 = vmatprep.mubr.bf16.mxu1 %v4601_v47 }
 0x233   :  { %2342 = vmatprep.mubr.bf16.mxu0 %v4617_v4  ;;  %2354 = vmatpush1.bf16.msra.mxu1 %v4129_v19  ;;  %v4210_v19 = vld [vmem:[#allocation6 + $0x4f0] ss:$24 sps:$4 sm:$0xff]  }
 0x234   :  { %2407 = vmatpush1.bf16.msra.mxu0 %v4132_v20  ;;  %2355 = vmatprep.subr.bf16.mxu1 %v4137_v21  ;;  %v4215_v20 = vld [vmem:[#allocation6 + $0x1c4] ss:$24 sps:$4 sm:$0xff]  }
 0x235   :  { %2408 = vmatprep.subr.bf16.mxu0 %v4140_v22  ;;  %v4218_v21 = vld [vmem:[#allocation6 + $0x4c4] ss:$24 sps:$4 sm:$0xff]   ;;  %v4213_v22 = vld [vmem:[#allocation6 + $0x1c0] ss:$24 sps:$4 sm:$0xff]  }
 0x237   :  { %2356 = vmatpush1.bf16.msra.mxu1 %v4135_v23  ;;  %v4216_v23 = vld [vmem:[#allocation6 + $0x4c0] ss:$24 sps:$4 sm:$0xff]  }
 0x238   :  { %2409 = vmatpush1.bf16.msra.mxu0 %v4138_v24  ;;  %2357 = vmatprep.subr.bf16.mxu1 %v4143_v25  ;;  %v4221_v24 = vld [vmem:[#allocation6 + $0x194] ss:$24 sps:$4 sm:$0xff]  }
 0x239   :  { %2290 = vmatmul.mubr.bf16.gmra.mxu1 %v4607_v59  ;;  %2410 = vmatprep.subr.bf16.mxu0 %v4146_v26  ;;  %v4224_v25 = vld [vmem:[#allocation6 + $0x494] ss:$24 sps:$4 sm:$0xff]   ;;  %v4219_v26 = vld [vmem:[#allocation6 + $0x190] ss:$24 sps:$4 sm:$0xff]  }
 0x23a   :  { %2343 = vmatmul.mubr.bf16.gmra.mxu0 %v4623_v13  ;;  %2385 = vmatprep.mubr.bf16.mxu1 %v4587_v33  ;;  %v4159_v33 = vld [vmem:[#allocation6 + $0x70] ss:$24 sps:$4 sm:$0xff]  }
 0x23b   :  { %2358 = vmatpush1.bf16.msra.mxu1 %v4141_v27  ;;  %2438 = vmatprep.mubr.bf16.mxu0 %v4589_v37  ;;  %v4162_v37 = vld [vmem:[#allocation6 + $0x370] ss:$24 sps:$4 sm:$0xff]  }
 0x23c   :  { %2411 = vmatpush1.bf16.msra.mxu0 %v4144_v28  ;;  %2359 = vmatprep.subr.bf16.mxu1 %v4149_v29  ;;  %v4222_v27 = vld [vmem:[#allocation6 + $0x490] ss:$24 sps:$4 sm:$0xff]   ;;  %v4227_v28 = vld [vmem:[#allocation6 + $0x764] ss:$24 sps:$4 sm:$0xff]  }
 0x23d   :  { %2412 = vmatprep.subr.bf16.mxu0 %v4152_v30  ;;  %v4273_v29 = vld [vmem:[#allocation12 + $0x78] sm:$0xff]   ;;  %v4225_v30 = vld [vmem:[#allocation6 + $0x760] ss:$24 sps:$4 sm:$0xff]  }
 0x23f   :  { %2360 = vmatpush1.bf16.msra.mxu1 %v4147_v31  ;;  %v4230_v31 = vld [vmem:[#allocation6 + $0x734] ss:$24 sps:$4 sm:$0xff]  }
 0x240   :  { %2413 = vmatpush1.bf16.msra.mxu0 %v4150_v32  ;;  %2361 = vmatprep.subr.bf16.mxu1 %v4155_v34  ;;  %v4274_v32 = vld [vmem:[#allocation12 + $0x38] sm:$0xff]   ;;  %v4275_v34 = vld [vmem:[#allocation12 + $0x70] sm:$0xff]  }
 0x241   :  { %2414 = vmatprep.subr.bf16.mxu0 %v4158_v35  ;;  %v4228_v35 = vld [vmem:[#allocation6 + $0x730] ss:$24 sps:$4 sm:$0xff]  }
 0x243   :  { %2362 = vmatpush1.bf16.msra.mxu1 %v4153_v36  ;;  %v4233_v36 = vld [vmem:[#allocation6 + $0x704] ss:$24 sps:$4 sm:$0xff]  }
 0x244   :  { %2415 = vmatpush1.bf16.msra.mxu0 %v4156_v39  ;;  %2363 = vmatprep.subr.bf16.mxu1 %v4161_v42  ;;  %v4276_v39 = vld [vmem:[#allocation12 + $0x30] sm:$0xff]   ;;  %v4277_v42 = vld [vmem:[#allocation12 + $0x68] sm:$0xff]  }
 0x245   :  { %2416 = vmatprep.subr.bf16.mxu0 %v4164_v43  ;;  %v4231_v43 = vld [vmem:[#allocation6 + $0x700] ss:$24 sps:$4 sm:$0xff]  }
 0x247   :  { %2364 = vmatpush1.bf16.msra.mxu1 %v4159_v33  ;;  %v4236_v33 = vld [vmem:[#allocation6 + $0x6d4] ss:$24 sps:$4 sm:$0xff]  }
 0x248   :  { %2417 = vmatpush1.bf16.msra.mxu0 %v4162_v37  ;;  %2365 = vmatprep.subr.bf16.mxu1 %v4167_v44  ;;  %v4280_v37 = vld [vmem:[#allocation12 + $0x20] sm:$0xff]   ;;  %v4281_v44 = vld [vmem:[#allocation12 + $0x58] sm:$0xff]  }
 0x249   :  { %2418 = vmatprep.subr.bf16.mxu0 %v4170_v46  ;;  %v4237_v46 = vld [vmem:[#allocation6 + $0x6a0] ss:$24 sps:$4 sm:$0xff]  }
 0x24b   :  { %2366 = vmatpush1.bf16.msra.mxu1 %v4165_v48  ;;  %v4242_v48 = vld [vmem:[#allocation6 + $0x674] ss:$24 sps:$4 sm:$0xff]  }
 0x24c   :  { %2419 = vmatpush1.bf16.msra.mxu0 %v4168_v49  ;;  %2367 = vmatprep.subr.bf16.mxu1 %v4173_v50  ;;  %v4283_v49 = vld [vmem:[#allocation12 + $0x50] sm:$0xff]  }
 0x24d   :  { %2420 = vmatprep.subr.bf16.mxu0 %v4176_v51  ;;  %v4284_v50 = vld [vmem:[#allocation12 + $0x10] sm:$0xff]   ;;  %v4285_v51 = vld [vmem:[#allocation12 + $0x48] sm:$0xff]  }
 0x24f   :  { %2368 = vmatpush1.bf16.msra.mxu1 %v4171_v52  ;;  %v4243_v52 = vld [vmem:[#allocation6 + $0x640] ss:$24 sps:$4 sm:$0xff]  }
 0x250   :  { %2421 = vmatpush1.bf16.msra.mxu0 %v4174_v53  ;;  %2369 = vmatprep.subr.bf16.mxu1 %v4179_v54  ;;  %v4248_v53 = vld [vmem:[#allocation6 + $0x614] ss:$24 sps:$4 sm:$0xff]  }
 0x251   :  { %2422 = vmatprep.subr.bf16.mxu0 %v4182_v55  ;;  %v4286_v54 = vld [vmem:[#allocation12 + $0x8] sm:$0xff]   ;;  %v4287_v55 = vld [vmem:[#allocation12 + $0x40] sm:$0xff]  }
 0x253   :  { %2370 = vmatpush2.bf16.msra.mxu1 %v4177_v56  ;;  %v4246_v56 = vld [vmem:[#allocation6 + $0x610] ss:$24 sps:$4 sm:$0xff]  }
 0x254   :  { %2423 = vmatpush2.bf16.msra.mxu0 %v4180_v57  ;;  %2371 = vmatprep.subr.bf16.mxu1 %v4185_v60  ;;  %v4251_v57 = vld [vmem:[#allocation6 + $0x8e4] ss:$24 sps:$4 sm:$0xff]   ;;  %v4288_v60 = vld [vmem:[#allocation12] sm:$0xff]  }
 0x255   :  { %2424 = vmatprep.subr.bf16.mxu0 %v4188_v62  ;;  %v4289_v62 = vld [vmem:[#allocation12 + $0xf8] sm:$0xff]  }
 0x257   :  { %2372 = vmatpush2.bf16.msra.mxu1 %v4183_v63  ;;  %v4249_v63 = vld [vmem:[#allocation6 + $0x8e0] ss:$24 sps:$4 sm:$0xff]  }
 0x258   :  { %2425 = vmatpush2.bf16.msra.mxu0 %v4186_v0  ;;  %2373 = vmatprep.subr.bf16.mxu1 %v4191_v2  ;;  %v4254_v0 = vld [vmem:[#allocation6 + $0x8b4] ss:$24 sps:$4 sm:$0xff]  }
 0x259   :  { %2426 = vmatprep.subr.bf16.mxu0 %v4194_v3  ;;  %v4252_v3 = vld [vmem:[#allocation6 + $0x8b0] ss:$24 sps:$4 sm:$0xff]  }
 0x25b   :  { %2374 = vmatpush2.bf16.msra.mxu1 %v4189_v5  ;;  %v4257_v5 = vld [vmem:[#allocation6 + $0x884] ss:$24 sps:$4 sm:$0xff]  }
 0x25c   :  { %2427 = vmatpush2.bf16.msra.mxu0 %v4192_v6  ;;  %2375 = vmatprep.subr.bf16.mxu1 %v4197_v7  ;;  %v4255_v7 = vld [vmem:[#allocation6 + $0x880] ss:$24 sps:$4 sm:$0xff]  }
 0x25d   :  { %2428 = vmatprep.subr.bf16.mxu0 %v4200_v8  ;;  %v4260_v8 = vld [vmem:[#allocation6 + $0x854] ss:$24 sps:$4 sm:$0xff]  }
 0x25f   :  { %2376 = vmatpush2.bf16.msra.mxu1 %v4195_v9 }
 0x260   :  { %2429 = vmatpush2.bf16.msra.mxu0 %v4198_v10  ;;  %2377 = vmatprep.subr.bf16.mxu1 %v4203_v11  ;;  %v4258_v10 = vld [vmem:[#allocation6 + $0x850] ss:$24 sps:$4 sm:$0xff]   ;;  %v4263_v11 = vld [vmem:[#allocation6 + $0x824] ss:$24 sps:$4 sm:$0xff]  }
 0x261   :  { %2430 = vmatprep.subr.bf16.mxu0 %v4206_v12 }
 0x263   :  { %2378 = vmatpush2.bf16.msra.mxu1 %v4201_v14 }
 0x264   :  { %2431 = vmatpush2.bf16.msra.mxu0 %v4204_v15  ;;  %2379 = vmatprep.subr.bf16.mxu1 %v4209_v16  ;;  %v4261_v15 = vld [vmem:[#allocation6 + $0x820] ss:$24 sps:$4 sm:$0xff]   ;;  %v4266_v16 = vld [vmem:[#allocation6 + $0x7f4] ss:$24 sps:$4 sm:$0xff]  }
 0x265   :  { %2432 = vmatprep.subr.bf16.mxu0 %v4212_v17 }
 0x267   :  { %2380 = vmatpush2.bf16.msra.mxu1 %v4207_v18 }
 0x268   :  { %2433 = vmatpush2.bf16.msra.mxu0 %v4210_v19  ;;  %2381 = vmatprep.subr.bf16.mxu1 %v4215_v20  ;;  %v4264_v19 = vld [vmem:[#allocation6 + $0x7f0] ss:$24 sps:$4 sm:$0xff]   ;;  %v4269_v20 = vld [vmem:[#allocation6 + $0x7c4] ss:$24 sps:$4 sm:$0xff]  }
 0x269   :  { %2434 = vmatprep.subr.bf16.mxu0 %v4218_v21 }
 0x26b   :  { %2382 = vmatpush2.bf16.msra.mxu1 %v4213_v22  ;;  %v4645_v22 = vshrl.u32 %v124_v38, 7 }
 0x26c   :  { %2435 = vmatpush2.bf16.msra.mxu0 %v4216_v23  ;;  %2383 = vmatprep.subr.bf16.mxu1 %v4221_v24  ;;  %v4267_v24 = vld [vmem:[#allocation6 + $0x7c0] ss:$24 sps:$4 sm:$0xff]  }
 0x26d   :  { %2436 = vmatprep.subr.bf16.mxu0 %v4224_v25  ;;  %v4272_v25 = vld [vmem:[#allocation6 + $0x794] ss:$24 sps:$4 sm:$0xff]  }
 0x26f   :  { %2384 = vmatpush2.bf16.msra.mxu1 %v4219_v26 }
 0x270   :  { %2437 = vmatpush2.bf16.msra.mxu0 %v4222_v27  ;;  %2459 = vmatprep.subr.bf16.mxu1 %v4227_v28  ;;  %v2069_v2 = vpop.f32.mrf.mxu1  ;;  %v2516_v28 = vsub.s32 0, %v4645_v22 }
 0x271   :  { %3728 = vmatprep.subr.bf16.mxu0 %v4273_v29  ;;  %v2122_v14 = vpop.f32.mrf.mxu0  ;;  %v4270_v29 = vld [vmem:[#allocation6 + $0x790] ss:$24 sps:$4 sm:$0xff]  }
 0x272   :  { %2386 = vmatmul.mubr.bf16.vlgmr.msra.gmra.mxu1 %v4591_v40  ;;  %v4278_v40 = vld [vmem:[#allocation12 + $0x28] sm:$0xff]   ;;  %v2071_v6 = vpop.f32.mrf.mxu1  ;;  %v2123_v38 = vadd.f32 %v2122_v14, %v2069_v2  ;;  %v2654_v2 = vld [vmem:[#allocation11 + $0x30] sm:$0xff] }
 0x273   :  { %2439 = vmatmul.mubr.bf16.vlgmr.msra.gmra.mxu0 %v4593_v41  ;;  %2395 = vmatprep.mubr.bf16.mxu1 %v4598_v45  ;;  %v4279_v41 = vld [vmem:[#allocation12 + $0x60] sm:$0xff]   ;;  %v2124_v18 = vpop.f32.mrf.mxu0 }
 0x274   :  { %2448 = vmatprep.mubr.bf16.mxu0 %v4601_v47  ;;  %2460 = vmatpush1.bf16.msra.mxu1 %v4225_v30  ;;  %v4234_v45 = vld [vmem:[#allocation6 + $0x6d0] ss:$24 sps:$4 sm:$0xff]   ;;  %v4239_v47 = vld [vmem:[#allocation6 + $0x6a4] ss:$24 sps:$4 sm:$0xff]   ;;  %v2073_v9 = vpop.f32.mrf.mxu1 }
 0x275   :  { %2461 = vmatprep.subr.bf16.mxu1 %v4230_v31  ;;  %3729 = vmatpush3.bf16.msra.mxu0 %v4274_v32  ;;  %v2126_v23 = vpop.f32.mrf.mxu0  ;;  %v4648_v30 = vld [vmem:[#allocation8] sm:$0x3f]  ;;  %v2520_v31 = vsub.s32 1, %v4645_v22 }
 0x276   :  { %3730 = vmatprep.subr.bf16.mxu0 %v4275_v34  ;;  %v2075_v12 = vpop.f32.mrf.mxu1  ;;  %v4651_v34 = vld [vmem:[#allocation9] sm:$0x3f] }
 0x277   :  { %v2128_v27 = vpop.f32.mrf.mxu0 }
 0x278   :  { %2462 = vmatpush1.bf16.msra.mxu1 %v4228_v35  ;;  %v2079_v17 = vpop.f32.mrf.mxu1 }
 0x279   :  { %2463 = vmatprep.subr.bf16.mxu1 %v4233_v36  ;;  %3731 = vmatpush3.bf16.msra.mxu0 %v4276_v39  ;;  %v2132_v35 = vpop.f32.mrf.mxu0  ;;  %v2517_v36 = vrot.slane %v4648_v30, %v2516_v28 }
 0x27a   :  { %2396 = vmatmul.mubr.bf16.gmra.mxu1 %v4605_v58  ;;  %3732 = vmatprep.subr.bf16.mxu0 %v4277_v42  ;;  %v4282_v58 = vld [vmem:[#allocation12 + $0x18] sm:$0xff]   ;;  %v2081_v21 = vpop.f32.mrf.mxu1  ;;  %v2125_v42 = vadd.f32 %v2124_v18, %v2071_v6 }
 0x27b   :  { %2449 = vmatmul.mubr.bf16.gmra.mxu0 %v4607_v59  ;;  %2491 = vmatprep.mubr.bf16.mxu1 %v4610_v61  ;;  %v4240_v59 = vld [vmem:[#allocation6 + $0x670] ss:$24 sps:$4 sm:$0xff]   ;;  %v4245_v61 = vld [vmem:[#allocation6 + $0x644] ss:$24 sps:$4 sm:$0xff]  }
 0x27c   :  { %2464 = vmatpush1.bf16.msra.mxu1 %v4231_v43  ;;  %v2083_v26 = vpop.f32.mrf.mxu1 }
 0x27d   :  { %2465 = vmatprep.subr.bf16.mxu1 %v4236_v33  ;;  %3733 = vmatpush3.bf16.msra.mxu0 %v4278_v40  ;;  %v2573_v33 = vrot.slane %v4651_v34, %v2516_v28  ;;  %v2521_v40 = vrot.slane %v4648_v30, %v2520_v31 }
 0x27e   :  { %3734 = vmatprep.subr.bf16.mxu0 %v4279_v41  ;;  %v2085_v32 = vpop.f32.mrf.mxu1 }
 0x280   :  { %2466 = vmatpush1.bf16.msra.mxu1 %v4234_v45  ;;  %v2127_v45 = vadd.f32 %v2126_v23, %v2073_v9 }
 0x281   :  { %2467 = vmatprep.subr.bf16.mxu1 %v4239_v47  ;;  %3735 = vmatpush3.bf16.msra.mxu0 %v4280_v37  ;;  %v2134_v47 = vpop.f32.mrf.mxu0 }
 0x282   :  { %3736 = vmatprep.subr.bf16.mxu0 %v4281_v44 }
 0x284   :  { %2468 = vmatpush1.bf16.msra.mxu1 %v4237_v46  ;;  %v2577_v46 = vrot.slane %v4651_v34, %v2520_v31 }
 0x285   :  { %2469 = vmatprep.subr.bf16.mxu1 %v4242_v48  ;;  %3737 = vmatpush3.bf16.msra.mxu0 %v4282_v58  ;;  %v2129_v58 = vadd.f32 %v2128_v27, %v2075_v12  ;;  %v2655_v12 = vld [vmem:[#allocation11 + $0x38] sm:$0xff] }
 0x286   :  { %3738 = vmatprep.subr.bf16.mxu0 %v4283_v49 }
 0x288   :  { %2470 = vmatpush1.bf16.msra.mxu1 %v4240_v59 }
 0x289   :  { %2471 = vmatprep.subr.bf16.mxu1 %v4245_v61  ;;  %3739 = vmatpush3.bf16.msra.mxu0 %v4284_v50 }
 0x28a   :  { %3740 = vmatprep.subr.bf16.mxu0 %v4285_v51  ;;  %v2136_v51 = vpop.f32.mrf.mxu0 }
 0x28c   :  { %2472 = vmatpush1.bf16.msra.mxu1 %v4243_v52 }
 0x28d   :  { %2473 = vmatprep.subr.bf16.mxu1 %v4248_v53  ;;  %3741 = vmatpush3.bf16.msra.mxu0 %v4286_v54 }
 0x28e   :  { %3742 = vmatprep.subr.bf16.mxu0 %v4287_v55  ;;  %v2133_v55 = vadd.f32 %v2132_v35, %v2079_v17 }
 0x290   :  { %2474 = vmatpush1.bf16.msra.mxu1 %v4246_v56 }
 0x291   :  { %2475 = vmatprep.subr.bf16.mxu1 %v4251_v57  ;;  %3743 = vmatpush3.bf16.msra.mxu0 %v4288_v60  ;;  %v2135_v60 = vadd.f32 %v2134_v47, %v2081_v21 }
 0x292   :  { %3750 = vmatprep.subr.bf16.mxu0 %v4289_v62 }
 0x294   :  { %2476 = vmatpush2.bf16.msra.mxu1 %v4249_v63 }
 0x295   :  { %2477 = vmatprep.subr.bf16.mxu1 %v4254_v0  ;;  %v2137_v0 = vadd.f32 %v2136_v51, %v2083_v26 }
 0x298   :  { %2478 = vmatpush2.bf16.msra.mxu1 %v4252_v3 }
 0x299   :  { %2479 = vmatprep.subr.bf16.mxu1 %v4257_v5  ;;  %v2138_v5 = vpop.f32.mrf.mxu0 }
 0x29c   :  { %2480 = vmatpush2.bf16.msra.mxu1 %v4255_v7 }
 0x29d   :  { %2481 = vmatprep.subr.bf16.mxu1 %v4260_v8 }
 0x2a0   :  { %2482 = vmatpush2.bf16.msra.mxu1 %v4258_v10 }
 0x2a1   :  { %2483 = vmatprep.subr.bf16.mxu1 %v4263_v11  ;;  %v2649_v11 = vld [vmem:[#allocation11 + $0x8] sm:$0xff] }
 0x2a4   :  { %2484 = vmatpush2.bf16.msra.mxu1 %v4261_v15 }
 0x2a5   :  { %2485 = vmatprep.subr.bf16.mxu1 %v4266_v16 }
 0x2a8   :  { %2486 = vmatpush2.bf16.msra.mxu1 %v4264_v19 }
 0x2a9   :  { %2487 = vmatprep.subr.bf16.mxu1 %v4269_v20  ;;  %v2139_v20 = vadd.f32 %v2138_v5, %v2085_v32 }
 0x2ac   :  { %2488 = vmatpush2.bf16.msra.mxu1 %v4267_v24 }
 0x2ad   :  { %2489 = vmatprep.subr.bf16.mxu1 %v4272_v25 }
 0x2b0   :  { %2490 = vmatpush2.bf16.msra.mxu1 %v4270_v29  ;;  %v2175_v39 = vpop.f32.mrf.mxu1 }
 0x2b1   :  { %v2176_v43 = vadd.f32 %v2175_v39, %v2123_v38  ;;  %v2660_v39 = vld [vmem:[#allocation11 + $0x60] sm:$0xff] }
 0x2b2   :  { %v2177_v41 = vpop.f32.mrf.mxu1 }
 0x2b3   :  { %v2544_v37 = vmul.f32 %v2517_v36, %v2176_v43  ;;  %2492 = vmatmul.mubr.bf16.vlgmr.msra.gmra.mxu1 %v4615_v1  ;;  %v2178_v44 = vadd.f32 %v2177_v41, %v2125_v42  ;;  %v2648_v1 = vld [vmem:[#allocation11] sm:$0xff]  ;;  %v2666_v42 = vld [vmem:[#allocation11 + $0x90] sm:$0xff] }
 0x2b4   :  { %2501 = vmatprep.mubr.bf16.mxu1 %v4617_v4  ;;  %v2179_v48 = vpop.f32.mrf.mxu1 }
 0x2b5   :  { %v2600_v49 = vadd.f32 %v2573_v33, %v2544_v37  ;;  %v2545_v59 = vmul.f32 %v2521_v40, %v2178_v44  ;;  %v2180_v61 = vadd.f32 %v2179_v48, %v2127_v45 }
 0x2b6   :  { %v2181_v50 = vpop.f32.mrf.mxu1 }
 0x2b7   :  { %v2601_v52 = vadd.f32 %v2577_v46, %v2545_v59  ;;  %v2550_v53 = vmul.f32 %v2517_v36, %v2180_v61  ;;  %v2182_v54 = vadd.f32 %v2181_v50, %v2129_v58  ;;  %v2624_v56 = vmax.f32 %v2600_v49, 0.0  ;;  %v2661_v49 = vld [vmem:[#allocation11 + $0x68] sm:$0xff] }
 0x2b8   :  { %v2185_v57 = vpop.f32.mrf.mxu1 }
 0x2b9   :  { %v2606_v62 = vadd.f32 %v2573_v33, %v2550_v53  ;;  %v2551_v63 = vmul.f32 %v2521_v40, %v2182_v54  ;;  %v2186_v4 = vadd.f32 %v2185_v57, %v2133_v55  ;;  %v2625_v6 = vmax.f32 %v2601_v52, 0.0 }
 0x2ba   :  { %v2187_v3 = vpop.f32.mrf.mxu1  ;;  %v2672_v10 = vmul.f32 %v2648_v1, %v2624_v56 }
 0x2bb   :  { %v2630_v7 = vmax.f32 %v2606_v62, 0.0  ;;  %v2607_v8 = vadd.f32 %v2577_v46, %v2551_v63  ;;  %2502 = vmatmul.mubr.bf16.gmra.mxu1 %v4623_v13  ;;  %v2188_v9 = vadd.f32 %v2187_v3, %v2135_v60  ;;  %v2556_v14 = vmul.f32 %v2517_v36, %v2186_v4 }
 0x2bc   :  { %v2189_v15 = vpop.f32.mrf.mxu1  ;;  %v2673_v24 = vmul.f32 %v2649_v11, %v2625_v6 }
 0x2bd   :  { %v2678_v16 = vmul.f32 %v2654_v2, %v2630_v7  ;;  %v2631_v17 = vmax.f32 %v2607_v8, 0.0  ;;  %v2557_v18 = vmul.f32 %v2521_v40, %v2188_v9  ;;  %v2190_v19 = vadd.f32 %v2189_v15, %v2137_v0  ;;  %v2228_v7 = vpop.f32.mrf.mxu0 }
 0x2be   :  { %v2612_v21 = vadd.f32 %v2573_v33, %v2556_v14  ;;  %v2191_v23 = vpop.f32.mrf.mxu1 }
 0x2bf   :  { %v2696_v25 = vmax.f32 %v2672_v10, %v2678_v16  ;;  %v2679_v26 = vmul.f32 %v2655_v12, %v2631_v17  ;;  %v2562_v27 = vmul.f32 %v2517_v36, %v2190_v19  ;;  %v2613_v28 = vadd.f32 %v2577_v46, %v2557_v18  ;;  %v2667_v36 = vld [vmem:[#allocation11 + $0x98] sm:$0xff]  ;;  %v2230_v15 = vpop.f32.mrf.mxu0 }
 0x2c0   :  { %v2192_v29 = vadd.f32 %v2191_v23, %v2139_v20  ;;  %v2636_v38 = vmax.f32 %v2612_v21, 0.0 }
 0x2c1   :  { %v2697_v13 = vrot.slane %v2696_v25, 4  ;;  %v2703_v31 = vmax.f32 %v2673_v24, %v2679_v26  ;;  %v2618_v35 = vadd.f32 %v2573_v33, %v2562_v27  ;;  %v2637_v37 = vmax.f32 %v2613_v28, 0.0  ;;  %v2232_v21 = vpop.f32.mrf.mxu0  ;;  %v4291_v27 = vld [vmem:[#allocation12 + $0xf0] sm:$0xff]  }
 0x2c2   :  { %v2563_v43 = vmul.f32 %v2521_v40, %v2192_v29  ;;  %v2684_v58 = vmul.f32 %v2660_v39, %v2636_v38  ;;  %v4292_v29 = vld [vmem:[#allocation12 + $0xb0] sm:$0xff]   ;;  %v4294_v38 = vld [vmem:[#allocation12 + $0xa8] sm:$0xff]  }
 0x2c3   :  { %v2698_v41 = vmax.f32 %v2696_v25, %v2697_v13  ;;  %v2704_v45 = vrot.slane %v2703_v31, 4  ;;  %v2642_v47 = vmax.f32 %v2618_v35, 0.0  ;;  %v2685_v52 = vmul.f32 %v2661_v49, %v2637_v37  ;;  %v4290_v25 = vld [vmem:[#allocation12 + $0xb8] sm:$0xff]   ;;  %v2234_v28 = vpop.f32.mrf.mxu0  ;;  %v4293_v13 = vld [vmem:[#allocation12 + $0xe8] sm:$0xff]   ;;  %v4295_v35 = vld [vmem:[#allocation12 + $0xe0] sm:$0xff]  }
 0x2c4   :  { %v2619_v32 = vadd.f32 %v2577_v46, %v2563_v43  ;;  %v4297_v43 = vld [vmem:[#allocation12 + $0xd8] sm:$0xff]   ;;  %v4299_v37 = vld [vmem:[#allocation12 + $0xd0] sm:$0xff]  }
 0x2c5   :  { %v2699_v44 = vrot.slane %v2698_v41, 2  ;;  %v2705_v48 = vmax.f32 %v2703_v31, %v2704_v45  ;;  %v2690_v59 = vmul.f32 %v2666_v42, %v2642_v47  ;;  %v2238_v31 = vpop.f32.mrf.mxu0  ;;  %v4296_v42 = vld [vmem:[#allocation12 + $0xa0] sm:$0xff]   ;;  %v4298_v45 = vld [vmem:[#allocation12 + $0x98] sm:$0xff]   ;;  %v2524_v47 = vsub.s32 2, %v4645_v22 }
 0x2c6   :  { %v2643_v61 = vmax.f32 %v2619_v32, 0.0 }
 0x2c7   :  { %v2706_v50 = vrot.slane %v2705_v48, 2  ;;  %v2738_v51 = vmax.f32 %v2684_v58, %v2690_v59  ;;  %v2700_v33 = vmax.f32 %v2698_v41, %v2699_v44  ;;  %v2240_v39 = vpop.f32.mrf.mxu0  ;;  %v2528_v44 = vsub.s32 3, %v4645_v22  ;;  %v4300_v58 = vld [vmem:[#allocation12 + $0x90] sm:$0xff]  }
 0x2c8   :  { %v2691_v53 = vmul.f32 %v2667_v36, %v2643_v61  ;;  %v4667_v36 = vrot.slane %v4648_v30, %v2524_v47  ;;  %v4301_v61 = vld [vmem:[#allocation12 + $0xc8] sm:$0xff]  }
 0x2c9   :  { %v2739_v54 = vrot.slane %v2738_v51, 4  ;;  %v2707_v40 = vmax.f32 %v2705_v48, %v2706_v50  ;;  %v2701_v60 = vrot.slane %v2700_v33, 1  ;;  %v2242_v41 = vpop.f32.mrf.mxu0 }
 0x2ca   :  { %v2745_v55 = vmax.f32 %v2685_v52, %v2691_v53  ;;  %v4670_v52 = vrot.slane %v4651_v34, %v2524_v47 }
 0x2cb   :  { %v2740_v56 = vmax.f32 %v2738_v51, %v2739_v54  ;;  %v2708_v62 = vrot.slane %v2707_v40, 1  ;;  %v2702_v2 = vmax.f32 %v2700_v33, %v2701_v60  ;;  %v4663_v32 = vpop.f32.mrf.mxu0  ;;  %v4673_v54 = vrot.slane %v4648_v30, %v2528_v44 }
 0x2cc   :  { %v2746_v57 = vrot.slane %v2745_v55, 4  ;;  %v4677_v60 = vrot.slane %v4651_v34, %v2528_v44 }
 0x2cd   :  { %v2741_v1 = vrot.slane %v2740_v56, 2  ;;  %v2709_v3 = vmax.f32 %v2707_v40, %v2708_v62  ;;  %v2780_v9 = vpack.c.bf16 %v2702_v2, %v2702_v2  ;;  %v4302_v40 = vld [vmem:[#allocation12 + $0x88] sm:$0xff]   ;;  %v4303_v62 = vld [vmem:[#allocation12 + $0xc0] sm:$0xff]  }
 0x2ce   :  { %v2747_v46 = vmax.f32 %v2745_v55, %v2746_v57 }
 0x2cf   :  { %v2742_v63 = vmax.f32 %v2740_v56, %v2741_v1  ;;  %v2781_v12 = vpack.c.bf16 %v2709_v3, %v2709_v3  ;;  %v2907_v17 = vunpack.c.l.b16 %v2780_v9 }
 0x2d0   :  { %v2748_v0 = vrot.slane %v2747_v46, 2 }
 0x2d1   :  { %v2743_v4 = vrot.slane %v2742_v63, 1  ;;  %v2908_v18 = vunpack.c.l.b16 %v2781_v12 }
 0x2d2   :  { %v2749_v5 = vmax.f32 %v2747_v46, %v2748_v0 }
 0x2d3   :  { %v2744_v6 = vmax.f32 %v2742_v63, %v2743_v4 }
 0x2d4   :  { %v2750_v8 = vrot.slane %v2749_v5, 1 }
 0x2d5   :  { %v2786_v10 = vpack.c.bf16 %v2744_v6, %v2744_v6 }
 0x2d6   :  { %v2751_v11 = vmax.f32 %v2749_v5, %v2750_v8 }
 0x2d7   :  { %v2913_v14 = vunpack.c.l.b16 %v2786_v10 }
 0x2d8   :  { %v2787_v16 = vpack.c.bf16 %v2751_v11, %v2751_v11 }
 0x2d9   :  { %v2920_v20 = vsel %vm2919_vm6, %v2913_v14, %v2907_v17 }
 0x2da   :  { %v2914_v19 = vunpack.c.l.b16 %v2787_v16  ;;  %v2926_v26 = vpack.c.b16 %v2920_v20, %v2920_v20  ;;  %v2650_v16 = vld [vmem:[#allocation11 + $0x10] sm:$0xff] }
 0x2dc   :  { %v2921_v23 = vsel %vm2919_vm6, %v2914_v19, %v2908_v18 }
 0x2dd   :  { %v2927_v24 = vpack.c.b16 %v2921_v23, %v2921_v23 }
 0x2df   :  { %3258 = vmatprep.mubr.bf16.mxu0 %v2927_v24 }
 0x2e0   :  { %3259 = vmatmul.mubr.bf16.vlgmr.msra.gmra.mxu0 %v2926_v26  ;;  %v2651_v26 = vld [vmem:[#allocation11 + $0x18] sm:$0xff] }
 0x2e1   :  { %3751 = vmatpush3.bf16.msra.mxu0 %v4290_v25 }
 0x2e2   :  { %3752 = vmatprep.subr.bf16.mxu0 %v4291_v27 }
 0x2e5   :  { %3753 = vmatpush3.bf16.msra.mxu0 %v4292_v29 }
 0x2e6   :  { %3754 = vmatprep.subr.bf16.mxu0 %v4293_v13 }
 0x2e9   :  { %3755 = vmatpush3.bf16.msra.mxu0 %v4294_v38  ;;  %v2657_v38 = vld [vmem:[#allocation11 + $0x48] sm:$0xff] }
 0x2ea   :  { %3756 = vmatprep.subr.bf16.mxu0 %v4295_v35 }
 0x2ed   :  { %3757 = vmatpush3.bf16.msra.mxu0 %v4296_v42 }
 0x2ee   :  { %3758 = vmatprep.subr.bf16.mxu0 %v4297_v43 }
 0x2f1   :  { %v2281_v48 = vpop.f32.mrf.mxu1  ;;  %3759 = vmatpush3.bf16.msra.mxu0 %v4298_v45 }
 0x2f2   :  { %v2282_v49 = vadd.f32 %v2281_v48, %v2228_v7  ;;  %v2334_v59 = vpop.f32.mrf.mxu0  ;;  %3760 = vmatprep.subr.bf16.mxu0 %v4299_v37  ;;  %v4304_v7 = vld [vmem:[#allocation12 + $0x80] sm:$0xff]  }
 0x2f3   :  { %v2283_v50 = vpop.f32.mrf.mxu1 }
 0x2f4   :  { %v2335_v51 = vadd.f32 %v2334_v59, %v2282_v49  ;;  %v2284_v53 = vadd.f32 %v2283_v50, %v2230_v15  ;;  %v2336_v33 = vpop.f32.mrf.mxu0 }
 0x2f5   :  { %v2285_v55 = vpop.f32.mrf.mxu1  ;;  %3761 = vmatpush3.bf16.msra.mxu0 %v4300_v58 }
 0x2f6   :  { %v2546_v56 = vmul.f32 %v4667_v36, %v2335_v51  ;;  %v2337_v57 = vadd.f32 %v2336_v33, %v2284_v53  ;;  %v2286_v1 = vadd.f32 %v2285_v55, %v2232_v21  ;;  %v2338_v46 = vpop.f32.mrf.mxu0  ;;  %3762 = vmatprep.subr.bf16.mxu0 %v4301_v61  ;;  %v2656_v21 = vld [vmem:[#allocation11 + $0x40] sm:$0xff]  ;;  %v4305_v51 = vld [vmem:[#allocation12 + $0x178] sm:$0xff]  }
 0x2f7   :  { %v2287_v63 = vpop.f32.mrf.mxu1  ;;  %v4306_v55 = vld [vmem:[#allocation12 + $0x138] sm:$0xff]   ;;  %3772 = vmatprep.subr.bf16.mxu1 %v4305_v51  ;;  %v4318_v51 = vld [vmem:[#allocation12 + $0x108] sm:$0xff]  }
 0x2f8   :  { %v2602_v0 = vadd.f32 %v4670_v52, %v2546_v56  ;;  %v2547_v2 = vmul.f32 %v4673_v54, %v2337_v57  ;;  %v2339_v4 = vadd.f32 %v2338_v46, %v2286_v1  ;;  %v2288_v3 = vadd.f32 %v2287_v63, %v2234_v28  ;;  %v2340_v5 = vpop.f32.mrf.mxu0  ;;  %v2662_v57 = vld [vmem:[#allocation11 + $0x70] sm:$0xff]  ;;  %3773 = vmatpush3.bf16.msra.mxu1 %v4306_v55 }
 0x2f9   :  { %v2291_v6 = vpop.f32.mrf.mxu1  ;;  %3763 = vmatpush3.bf16.msra.mxu0 %v4302_v40 }
 0x2fa   :  { %v2603_v8 = vadd.f32 %v4677_v60, %v2547_v2  ;;  %v2552_v9 = vmul.f32 %v4667_v36, %v2339_v4  ;;  %v2341_v10 = vadd.f32 %v2340_v5, %v2288_v3  ;;  %v2344_v11 = vpop.f32.mrf.mxu0  ;;  %3764 = vmatprep.subr.bf16.mxu0 %v4303_v62  ;;  %v2626_v12 = vmax.f32 %v2602_v0, 0.0  ;;  %v2668_v62 = vld [vmem:[#allocation11 + $0xa0] sm:$0xff]  ;;  %v4307_v4 = vld [vmem:[#allocation12 + $0x170] sm:$0xff]   ;;  %v2663_v5 = vld [vmem:[#allocation11 + $0x78] sm:$0xff] }
 0x2fb   :  { %v2292_v14 = vadd.f32 %v2291_v6, %v2238_v31  ;;  %v2293_v15 = vpop.f32.mrf.mxu1  ;;  %v2669_v6 = vld [vmem:[#allocation11 + $0xa8] sm:$0xff]  ;;  %3774 = vmatprep.subr.bf16.mxu1 %v4307_v4 }
 0x2fc   :  { %v2608_v17 = vadd.f32 %v4670_v52, %v2552_v9  ;;  %v2553_v18 = vmul.f32 %v4673_v54, %v2341_v10  ;;  %v2346_v19 = vpop.f32.mrf.mxu0  ;;  %v2627_v20 = vmax.f32 %v2603_v8, 0.0  ;;  %v2294_v24 = vadd.f32 %v2293_v15, %v2240_v39  ;;  %v4309_v15 = vld [vmem:[#allocation12 + $0x168] sm:$0xff]  }
 0x2fd   :  { %v2345_v23 = vadd.f32 %v2344_v11, %v2292_v14  ;;  %v2295_v25 = vpop.f32.mrf.mxu1  ;;  %3765 = vmatpush3.bf16.msra.mxu0 %v4304_v7  ;;  %v2674_v31 = vmul.f32 %v2650_v16, %v2626_v12  ;;  %v4308_v7 = vld [vmem:[#allocation12 + $0x130] sm:$0xff]  }
 0x2fe   :  { %v2632_v27 = vmax.f32 %v2608_v17, 0.0  ;;  %v2609_v28 = vadd.f32 %v4677_v60, %v2553_v18  ;;  %v2296_v29 = vadd.f32 %v2295_v25, %v2242_v41  ;;  %v2348_v13 = vpop.f32.mrf.mxu0  ;;  %v2347_v42 = vadd.f32 %v2346_v19, %v2294_v24  ;;  %3775 = vmatpush3.bf16.msra.mxu1 %v4308_v7  ;;  %v4310_v17 = vld [vmem:[#allocation12 + $0x128] sm:$0xff]   ;;  %v4312_v25 = vld [vmem:[#allocation12 + $0x120] sm:$0xff]  }
 0x2ff   :  { %v2558_v35 = vmul.f32 %v4667_v36, %v2345_v23  ;;  %v2297_v43 = vpop.f32.mrf.mxu1  ;;  %v2675_v39 = vmul.f32 %v2651_v26, %v2627_v20  ;;  %3776 = vmatprep.subr.bf16.mxu1 %v4309_v15  ;;  %v4311_v23 = vld [vmem:[#allocation12 + $0x160] sm:$0xff]  }
 0x300   :  { %v2680_v45 = vmul.f32 %v2656_v21, %v2632_v27  ;;  %v2633_v47 = vmax.f32 %v2609_v28, 0.0  ;;  %v2349_v37 = vadd.f32 %v2348_v13, %v2296_v29  ;;  %v2298_v44 = vadd.f32 %v2297_v43, %v4663_v32  ;;  %v2350_v49 = vpop.f32.mrf.mxu0 }
 0x301   :  { %v2614_v48 = vadd.f32 %v4670_v52, %v2558_v35  ;;  %v2559_v58 = vmul.f32 %v4673_v54, %v2347_v42  ;;  %v4314_v35 = vld [vmem:[#allocation12 + $0x118] sm:$0xff]  }
 0x302   :  { %v2710_v59 = vmax.f32 %v2674_v31, %v2680_v45  ;;  %v2681_v41 = vmul.f32 %v2657_v38, %v2633_v47  ;;  %v2564_v61 = vmul.f32 %v4667_v36, %v2349_v37  ;;  %v2351_v50 = vadd.f32 %v2350_v49, %v2298_v44  ;;  %3777 = vmatpush3.bf16.msra.mxu1 %v4310_v17  ;;  %v4313_v31 = vld [vmem:[#allocation12 + $0x158] sm:$0xff]   ;;  %v4315_v44 = vld [vmem:[#allocation12 + $0x150] sm:$0xff]  }
 0x303   :  { %v2638_v53 = vmax.f32 %v2614_v48, 0.0  ;;  %v2615_v33 = vadd.f32 %v4677_v60, %v2559_v58  ;;  %3778 = vmatprep.subr.bf16.mxu1 %v4311_v23  ;;  %v4316_v48 = vld [vmem:[#allocation12 + $0x110] sm:$0xff]  }
 0x304   :  { %v2711_v40 = vrot.slane %v2710_v59, 4  ;;  %v2717_v56 = vmax.f32 %v2675_v39, %v2681_v41  ;;  %v2620_v32 = vadd.f32 %v4670_v52, %v2564_v61  ;;  %v2565_v1 = vmul.f32 %v4673_v54, %v2351_v50  ;;  %v4317_v50 = vld [vmem:[#allocation12 + $0x148] sm:$0xff]  }
 0x305   :  { %v2639_v46 = vmax.f32 %v2615_v33, 0.0  ;;  %v2686_v3 = vmul.f32 %v2662_v57, %v2638_v53  ;;  %v4319_v53 = vld [vmem:[#allocation12 + $0x140] sm:$0xff]  }
 0x306   :  { %v2712_v63 = vmax.f32 %v2710_v59, %v2711_v40  ;;  %v2718_v0 = vrot.slane %v2717_v56, 4  ;;  %v2644_v36 = vmax.f32 %v2620_v32, 0.0  ;;  %v2621_v2 = vadd.f32 %v4677_v60, %v2565_v1  ;;  %3779 = vmatpush3.bf16.msra.mxu1 %v4312_v25  ;;  %v4320_v57 = vld [vmem:[#allocation12 + $0x100] sm:$0xff]  }
 0x307   :  { %v2687_v11 = vmul.f32 %v2663_v5, %v2639_v46  ;;  %3780 = vmatprep.subr.bf16.mxu1 %v4313_v31 }
 0x308   :  { %v2713_v8 = vrot.slane %v2712_v63, 2  ;;  %v2719_v9 = vmax.f32 %v2717_v56, %v2718_v0  ;;  %v2692_v10 = vmul.f32 %v2668_v62, %v2644_v36  ;;  %v2645_v52 = vmax.f32 %v2621_v2, 0.0 }
 0x30a   :  { %v2720_v54 = vrot.slane %v2719_v9, 2  ;;  %v2752_v12 = vmax.f32 %v2686_v3, %v2692_v10  ;;  %v2693_v14 = vmul.f32 %v2669_v6, %v2645_v52  ;;  %v2714_v16 = vmax.f32 %v2712_v63, %v2713_v8  ;;  %3781 = vmatpush3.bf16.msra.mxu1 %v4314_v35 }
 0x30b   :  { %3782 = vmatprep.subr.bf16.mxu1 %v4315_v44  ;;  %v2536_v10 = vsub.s32 5, %v4645_v22 }
 0x30c   :  { %v2753_v18 = vrot.slane %v2752_v12, 4  ;;  %v2759_v60 = vmax.f32 %v2687_v11, %v2693_v14  ;;  %v2721_v19 = vmax.f32 %v2719_v9, %v2720_v54  ;;  %v2715_v24 = vrot.slane %v2714_v16, 1 }
 0x30d   :  { %v2532_v9 = vsub.s32 4, %v4645_v22 }
 0x30e   :  { %v2754_v20 = vmax.f32 %v2752_v12, %v2753_v18  ;;  %v2760_v21 = vrot.slane %v2759_v60, 4  ;;  %v2722_v28 = vrot.slane %v2721_v19, 1  ;;  %v2716_v38 = vmax.f32 %v2714_v16, %v2715_v24  ;;  %3783 = vmatpush3.bf16.msra.mxu1 %v4316_v48  ;;  %v2658_v48 = vld [vmem:[#allocation11 + $0x50] sm:$0xff] }
 0x30f   :  { %3784 = vmatprep.subr.bf16.mxu1 %v4317_v50  ;;  %v2533_v12 = vrot.slane %v4648_v30, %v2532_v9  ;;  %v2589_v17 = vrot.slane %v4651_v34, %v2532_v9  ;;  %v2537_v18 = vrot.slane %v4648_v30, %v2536_v10  ;;  %v2593_v24 = vrot.slane %v4651_v34, %v2536_v10  ;;  %v2664_v10 = vld [vmem:[#allocation11 + $0x80] sm:$0xff] }
 0x310   :  { %v2755_v26 = vrot.slane %v2754_v20, 2  ;;  %v2761_v27 = vmax.f32 %v2759_v60, %v2760_v21  ;;  %v2723_v43 = vmax.f32 %v2721_v19, %v2722_v28  ;;  %v2782_v39 = vpack.c.bf16 %v2716_v38, %v2716_v38 }
 0x312   :  { %v2756_v29 = vmax.f32 %v2754_v20, %v2755_v26  ;;  %v2762_v13 = vrot.slane %v2761_v27, 2  ;;  %v2783_v49 = vpack.c.bf16 %v2723_v43, %v2723_v43  ;;  %v2909_v33 = vunpack.c.l.b16 %v2782_v39  ;;  %3785 = vmatpush3.bf16.msra.mxu1 %v4318_v51 }
 0x313   :  { %3786 = vmatprep.subr.bf16.mxu1 %v4319_v53  ;;  %v2653_v53 = vld [vmem:[#allocation11 + $0x28] sm:$0xff] }
 0x314   :  { %v2757_v42 = vrot.slane %v2756_v29, 1  ;;  %v2763_v45 = vmax.f32 %v2761_v27, %v2762_v13  ;;  %v2910_v55 = vunpack.c.l.b16 %v2783_v49 }
 0x316   :  { %v2764_v47 = vrot.slane %v2763_v45, 1  ;;  %v2758_v37 = vmax.f32 %v2756_v29, %v2757_v42  ;;  %3787 = vmatpush3.bf16.msra.mxu1 %v4320_v57 }
 0x318   :  { %v2765_v58 = vmax.f32 %v2763_v45, %v2764_v47  ;;  %v2788_v59 = vpack.c.bf16 %v2758_v37, %v2758_v37  ;;  %v2652_v47 = vld [vmem:[#allocation11 + $0x20] sm:$0xff] }
 0x31a   :  { %v2789_v41 = vpack.c.bf16 %v2765_v58, %v2765_v58  ;;  %v2915_v61 = vunpack.c.l.b16 %v2788_v59 }
 0x31c   :  { %v2916_v40 = vunpack.c.l.b16 %v2789_v41  ;;  %v2922_v56 = vsel %vm2919_vm6, %v2915_v61, %v2909_v33  ;;  %v2659_v33 = vld [vmem:[#allocation11 + $0x58] sm:$0xff] }
 0x31d   :  { %v2928_v46 = vpack.c.b16 %v2922_v56, %v2922_v56 }
 0x31e   :  { %v2923_v32 = vsel %vm2919_vm6, %v2916_v40, %v2910_v55 }
 0x31f   :  { %v2929_v1 = vpack.c.b16 %v2923_v32, %v2923_v32 }
 0x321   :  { %3298 = vmatprep.mubr.bf16.mxu0 %v2929_v1 }
 0x322   :  { %3299 = vmatmul.mubr.bf16.vlgmr.msra.gmra.mxu0 %v2928_v46 }
 0x332   :  { %v2387_v62 = vpop.f32.mrf.mxu1 }
 0x333   :  { %v2440_v2 = vpop.f32.mrf.mxu0 }
 0x334   :  { %v2389_v63 = vpop.f32.mrf.mxu1  ;;  %v2441_v54 = vadd.f32 %v2440_v2, %v2387_v62 }
 0x335   :  { %v2442_v3 = vpop.f32.mrf.mxu0 }
 0x336   :  { %v2391_v0 = vpop.f32.mrf.mxu1  ;;  %v2443_v15 = vadd.f32 %v2442_v3, %v2389_v63 }
 0x337   :  { %v2444_v6 = vpop.f32.mrf.mxu0 }
 0x338   :  { %v2393_v36 = vpop.f32.mrf.mxu1  ;;  %v2445_v19 = vadd.f32 %v2444_v6, %v2391_v0 }
 0x339   :  { %v2446_v8 = vpop.f32.mrf.mxu0 }
 0x33a   :  { %v2397_v4 = vpop.f32.mrf.mxu1  ;;  %v2447_v25 = vadd.f32 %v2446_v8, %v2393_v36 }
 0x33b   :  { %v2450_v11 = vpop.f32.mrf.mxu0 }
 0x33c   :  { %v2399_v5 = vpop.f32.mrf.mxu1  ;;  %v2451_v42 = vadd.f32 %v2450_v11, %v2397_v4 }
 0x33d   :  { %v2452_v20 = vpop.f32.mrf.mxu0 }
 0x33e   :  { %v2401_v7 = vpop.f32.mrf.mxu1  ;;  %v2453_v45 = vadd.f32 %v2452_v20, %v2399_v5 }
 0x33f   :  { %v2454_v13 = vpop.f32.mrf.mxu0 }
 0x340   :  { %v2403_v52 = vpop.f32.mrf.mxu1  ;;  %v2455_v39 = vadd.f32 %v2454_v13, %v2401_v7 }
 0x341   :  { %v2456_v49 = vpop.f32.mrf.mxu0 }
 0x342   :  { %v2457_v46 = vadd.f32 %v2456_v49, %v2403_v52 }
 0x373   :  { %v2493_v14 = vpop.f32.mrf.mxu1 }
 0x374   :  { %v2494_v16 = vadd.f32 %v2493_v14, %v2441_v54  ;;  %v2670_v54 = vld [vmem:[#allocation11 + $0xb0] sm:$0xff] }
 0x375   :  { %v2495_v60 = vpop.f32.mrf.mxu1 }
 0x376   :  { %v2548_v21 = vmul.f32 %v2533_v12, %v2494_v16  ;;  %v2496_v23 = vadd.f32 %v2495_v60, %v2443_v15 }
 0x377   :  { %v2497_v22 = vpop.f32.mrf.mxu1 }
 0x378   :  { %v2604_v26 = vadd.f32 %v2589_v17, %v2548_v21  ;;  %v2549_v27 = vmul.f32 %v2537_v18, %v2496_v23  ;;  %v2498_v28 = vadd.f32 %v2497_v22, %v2445_v19  ;;  %v2665_v23 = vld [vmem:[#allocation11 + $0x88] sm:$0xff] }
 0x379   :  { %v2499_v29 = vpop.f32.mrf.mxu1 }
 0x37a   :  { %v2605_v31 = vadd.f32 %v2593_v24, %v2549_v27  ;;  %v2554_v38 = vmul.f32 %v2533_v12, %v2498_v28  ;;  %v2500_v35 = vadd.f32 %v2499_v29, %v2447_v25  ;;  %v2628_v43 = vmax.f32 %v2604_v26, 0.0 }
 0x37b   :  { %v2503_v30 = vpop.f32.mrf.mxu1 }
 0x37c   :  { %v2610_v37 = vadd.f32 %v2589_v17, %v2554_v38  ;;  %v2555_v44 = vmul.f32 %v2537_v18, %v2500_v35  ;;  %v2504_v34 = vadd.f32 %v2503_v30, %v2451_v42  ;;  %v2629_v59 = vmax.f32 %v2605_v31, 0.0 }
 0x37d   :  { %v2505_v58 = vpop.f32.mrf.mxu1  ;;  %v2676_v51 = vmul.f32 %v2652_v47, %v2628_v43 }
 0x37e   :  { %v2634_v41 = vmax.f32 %v2610_v37, 0.0  ;;  %v2611_v61 = vadd.f32 %v2593_v24, %v2555_v44  ;;  %v2506_v50 = vadd.f32 %v2505_v58, %v2453_v45  ;;  %v2560_v55 = vmul.f32 %v2533_v12, %v2504_v34 }
 0x37f   :  { %v2507_v40 = vpop.f32.mrf.mxu1  ;;  %v2677_v0 = vmul.f32 %v2653_v53, %v2629_v59 }
 0x380   :  { %v2682_v56 = vmul.f32 %v2658_v48, %v2634_v41  ;;  %v2635_v57 = vmax.f32 %v2611_v61, 0.0  ;;  %v2561_v32 = vmul.f32 %v2537_v18, %v2506_v50  ;;  %v2508_v1 = vadd.f32 %v2507_v40, %v2455_v39 }
 0x381   :  { %v2616_v62 = vadd.f32 %v2589_v17, %v2560_v55  ;;  %v2509_v63 = vpop.f32.mrf.mxu1 }
 0x382   :  { %v2724_v36 = vmax.f32 %v2676_v51, %v2682_v56  ;;  %v2683_v2 = vmul.f32 %v2659_v33, %v2635_v57  ;;  %v2566_v4 = vmul.f32 %v2533_v12, %v2508_v1  ;;  %v2617_v3 = vadd.f32 %v2593_v24, %v2561_v32  ;;  %v2671_v12 = vld [vmem:[#allocation11 + $0xb8] sm:$0xff] }
 0x383   :  { %v2510_v5 = vadd.f32 %v2509_v63, %v2457_v46  ;;  %v2640_v8 = vmax.f32 %v2616_v62, 0.0 }
 0x384   :  { %v2725_v6 = vrot.slane %v2724_v36, 4  ;;  %v2731_v7 = vmax.f32 %v2677_v0, %v2683_v2  ;;  %v2622_v9 = vadd.f32 %v2589_v17, %v2566_v4  ;;  %v2641_v60 = vmax.f32 %v2617_v3, 0.0 }
 0x385   :  { %v2567_v11 = vmul.f32 %v2537_v18, %v2510_v5  ;;  %v2688_v21 = vmul.f32 %v2664_v10, %v2640_v8 }
 0x386   :  { %v2726_v14 = vmax.f32 %v2724_v36, %v2725_v6  ;;  %v2732_v15 = vrot.slane %v2731_v7, 4  ;;  %v2646_v16 = vmax.f32 %v2622_v9, 0.0  ;;  %v2689_v28 = vmul.f32 %v2665_v23, %v2641_v60  ;;  %v3669_v36 = vld [vmem:[#allocation14] ss:$0 sm:$0xff] }
 0x387   :  { %v2623_v52 = vadd.f32 %v2593_v24, %v2567_v11 }
 0x388   :  { %v2727_v19 = vrot.slane %v2726_v14, 2  ;;  %v2733_v20 = vmax.f32 %v2731_v7, %v2732_v15  ;;  %v2694_v22 = vmul.f32 %v2670_v54, %v2646_v16 }
 0x389   :  { %v2647_v25 = vmax.f32 %v2623_v52, 0.0 }
 0x38a   :  { %v2734_v26 = vrot.slane %v2733_v20, 2  ;;  %v2766_v27 = vmax.f32 %v2688_v21, %v2694_v22  ;;  %v2728_v17 = vmax.f32 %v2726_v14, %v2727_v19 }
 0x38b   :  { %v2695_v29 = vmul.f32 %v2671_v12, %v2647_v25 }
 0x38c   :  { %v2767_v13 = vrot.slane %v2766_v27, 4  ;;  %v2735_v18 = vmax.f32 %v2733_v20, %v2734_v26  ;;  %v2729_v42 = vrot.slane %v2728_v17, 1 }
 0x38d   :  { %v2773_v31 = vmax.f32 %v2689_v28, %v2695_v29 }
 0x38e   :  { %v2768_v38 = vmax.f32 %v2766_v27, %v2767_v13  ;;  %v2736_v30 = vrot.slane %v2735_v18, 1  ;;  %v2730_v37 = vmax.f32 %v2728_v17, %v2729_v42 }
 0x38f   :  { %v2774_v35 = vrot.slane %v2773_v31, 4 }
 0x390   :  { %v2769_v43 = vrot.slane %v2768_v38, 2  ;;  %v2737_v39 = vmax.f32 %v2735_v18, %v2736_v30  ;;  %v2784_v49 = vpack.c.bf16 %v2730_v37, %v2730_v37 }
 0x391   :  { %v2775_v24 = vmax.f32 %v2773_v31, %v2774_v35 }
 0x392   :  { %v2770_v45 = vmax.f32 %v2768_v38, %v2769_v43  ;;  %v2785_v61 = vpack.c.bf16 %v2737_v39, %v2737_v39  ;;  %v2911_v53 = vunpack.c.l.b16 %v2784_v49 }
 0x393   :  { %v2776_v47 = vrot.slane %v2775_v24, 2 }
 0x394   :  { %v2771_v44 = vrot.slane %v2770_v45, 1  ;;  %v2912_v33 = vunpack.c.l.b16 %v2785_v61 }
 0x395   :  { %v2777_v48 = vmax.f32 %v2775_v24, %v2776_v47 }
 0x396   :  { %v2772_v34 = vmax.f32 %v2770_v45, %v2771_v44 }
 0x397   :  { %v2778_v58 = vrot.slane %v2777_v48, 1 }
 0x398   :  { %v2790_v59 = vpack.c.bf16 %v2772_v34, %v2772_v34 }
 0x399   :  { %v2779_v41 = vmax.f32 %v2777_v48, %v2778_v58 }
 0x39a   :  { %v2917_v50 = vunpack.c.l.b16 %v2790_v59 }
 0x39b   :  { %v2791_v51 = vpack.c.bf16 %v2779_v41, %v2779_v41 }
 0x39c   :  { %v2924_v40 = vsel %vm2919_vm6, %v2917_v50, %v2911_v53 }
 0x39d   :  { %v2918_v55 = vunpack.c.l.b16 %v2791_v51  ;;  %v2930_v1 = vpack.c.b16 %v2924_v40, %v2924_v40 }
 0x39f   :  { %v2925_v56 = vsel %vm2919_vm6, %v2918_v55, %v2912_v33 }
 0x3a0   :  { %v2931_v57 = vpack.c.b16 %v2925_v56, %v2925_v56  ;;  %v3744_v32 = vpop.f32.mrf.mxu0 }
 0x3a2   :  { %3338 = vmatprep.mubr.bf16.mxu1 %v2931_v57  ;;  %v3745_v46 = vpop.f32.mrf.mxu0 }
 0x3a3   :  { %3339 = vmatmul.mubr.bf16.vlgmr.msra.gmra.mxu1 %v2930_v1  ;;  %v3746_v62 = vadd.f32 %v3745_v46, %v3744_v32 }
 0x3a4   :  { %v3747_v63 = vpop.f32.mrf.mxu0 }
 0x3a5   :  { %v3261_v3 = vadd.f32 %v3746_v62, %v3669_v36 }
 0x3a6   :  { %v3748_v0 = vpop.f32.mrf.mxu0 }
 0x3e2   :  { %v3766_v2 = vpop.f32.mrf.mxu0 }
 0x3e4   :  { %v3767_v4 = vpop.f32.mrf.mxu0 }
 0x3e5   :  { %v3768_v5 = vadd.f32 %v3767_v4, %v3766_v2 }
 0x3e6   :  { %v3769_v6 = vpop.f32.mrf.mxu0 }
 0x3e7   :  { %v3301_v7 = vadd.f32 %v3768_v5, %v3261_v3 }
 0x3e8   :  { %v3770_v8 = vpop.f32.mrf.mxu0 }
 0x463   :  { %v3788_v9 = vpop.f32.mrf.mxu1 }
 0x465   :  { %v3789_v10 = vpop.f32.mrf.mxu1 }
 0x466   :  { %v3790_v54 = vadd.f32 %v3789_v10, %v3788_v9 }
 0x467   :  { %v3791_v11 = vpop.f32.mrf.mxu1 }
 0x468   :  { %v3341_v14 = vadd.f32 %v3790_v54, %v3301_v7 }
 0x469   :  { %v3792_v15 = vpop.f32.mrf.mxu1 }
 0x46a   :  { %3346 = vst [vmem:[#allocation15] sm:$0x3] %v3341_v14 }
 0x46b   :  { %4472 = shalt.err (!%p4469_p11)
}
 0x46c   :  { %3356 = dma.vmem_to_hbm [thread:$0]  %s3354_s4, 32, %s4716_s8, [#allocation5]  }
 0x46d   :  { %4489 = dma.done.wait [#allocation5], 32  }
 0x46e   :  { %4490 = vsyncadd [#allocation5], 4294967264 }
 0x46f   :  { %3360 = vsyncpa [#allocation4], 1 }
 0x470   :  { %3361 = vsyncpa [#allocation7], 1 }
 0x471   :  { %3362 = vsyncpa [#allocation10], 1 }
 0x472   :  { %3363 = vsyncpa [#allocation13], 1 }
 0x473   :  { %3364 = vsyncpa [#allocation5], 1 }

</bundles_post_ra>
